<compile_context>
chip_gen: v6e
topology: v6e:2x2x1
jax: 0.10.0
libtpu: 0.0.40
codegen_flags: <defaults>
</compile_context>

<pallas_src>
import jax
import jax.numpy as jnp
from jax.experimental import pallas as pl
from jax.experimental.pallas import tpu as pltpu


# ----------------------------------------------------------------------------
# Fused Pallas kernel (all layers + FC in a single invocation, no grid)
# ----------------------------------------------------------------------------
def make_fused_lstm_kernel(num_layers, S, B, H):
    """Builds the fused kernel for fixed (num_layers, S, B, H)."""

    def kernel(*refs):
        # refs: x_flat, (w_ih, w_hh, b) * L, fc_w, fc_b, out
        x_ref = refs[0]
        layer_refs = refs[1:1 + 3 * num_layers]
        fc_w_ref = refs[1 + 3 * num_layers]
        fc_b_ref = refs[2 + 3 * num_layers]
        out_ref = refs[3 + 3 * num_layers]

        f32 = jnp.float32
        bf16 = jnp.bfloat16

        # All weights are VMEM resident; matmul operands are bf16, biases f32.
        w_ih = [layer_refs[3 * l][...] for l in range(num_layers)]      # (D_in, 4H) bf16
        w_hh = [layer_refs[3 * l + 1][...] for l in range(num_layers)]  # (H, 4H)    bf16
        bias = [layer_refs[3 * l + 2][...] for l in range(num_layers)]  # (1, 4H)    f32

        # Layer-0 input projection for the WHOLE sequence: one MXU matmul with
        # the bias folded in.  Rows t*B:(t+1)*B hold time step t.  This (and the
        # per-step row slices of it) sit entirely off the recurrent h-chain.
        gx0 = jnp.dot(x_ref[...], w_ih[0], preferred_element_type=f32) + bias[0]

        def cell_step(gates, c_prev):
            # Full-vreg transcendentals: one sigmoid and one tanh over the whole
            # (B, 4H) tile, sliced afterwards (unused lanes are simply dropped).
            sig = jax.nn.sigmoid(gates)
            th = jnp.tanh(gates)
            i_g = sig[:, 0 * H:1 * H]
            f_g = sig[:, 1 * H:2 * H]
            g_g = th[:, 2 * H:3 * H]
            o_g = sig[:, 3 * H:4 * H]
            c_new = i_g * g_g if c_prev is None else f_g * c_prev + i_g * g_g
            h_new = o_g * jnp.tanh(c_new)
            return h_new, c_new

        h = [None] * num_layers
        c = [None] * num_layers
        # Layer l's per-step outputs, kept in vregs (consumed by layer l+1).
        h_seq = [[None] * S for _ in range(num_layers)]

        # Wavefront over (layer, time): at wavefront step s, layer l runs its
        # time step t = s - l.  The L recurrent chains overlap; no VMEM traffic
        # between layers.
        for s in range(S + num_layers - 1):
            for l in range(num_layers):
                t = s - l
                if t < 0 or t >= S:
                    continue
                if l == 0:
                    g_in = gx0[t * B:(t + 1) * B, :]
                else:
                    # Input projection of the layer below's fresh hidden state.
                    # It has one wavefront step of slack w.r.t. this layer's
                    # own recurrent chain, so it hides under the recurrence.
                    g_in = jnp.dot(h_seq[l - 1][t].astype(bf16), w_ih[l],
                                   preferred_element_type=f32) + bias[l]
                if t == 0:
                    gates = g_in                       # h_0 = 0: skip h @ W_hh
                else:
                    gates = g_in + jnp.dot(h[l].astype(bf16), w_hh[l],
                                           preferred_element_type=f32)
                h[l], c[l] = cell_step(gates, c[l])
                if l + 1 < num_layers:
                    h_seq[l][t] = h[l]

        # FC head: ONE batched matmul + ONE store after all recurrences.
        # PyTorch semantics: out = fc(h_out.view(-1, H)); rows are layer-major.
        h_final = jnp.concatenate(h, axis=0)           # (L*B, H) f32
        out_ref[...] = (jnp.dot(h_final.astype(bf16), fc_w_ref[...],
                                preferred_element_type=f32) + fc_b_ref[...])

    return kernel


# ----------------------------------------------------------------------------
# Wrapper
# ----------------------------------------------------------------------------
@jax.jit
def lstm_forward(x, params):
    """x: (B, S, D) batch_first. Returns fc(h_out.view(-1, H)) -> (L*B, O)."""
    B, S, D = x.shape
    lstm_params = params["lstm"]
    L = len(lstm_params)
    H = lstm_params[0][1].shape[0]
    O = params["fc_w_t"].shape[1]

    # time-major, flattened to (S*B, D) so the layer-0 x-projection is one matmul
    x_flat = jnp.transpose(x, (1, 0, 2)).reshape(S * B, D).astype(jnp.bfloat16)

    args = [x_flat]
    for (w_ih_t, w_hh_t, b) in lstm_params:
        args += [w_ih_t.astype(jnp.bfloat16),
                 w_hh_t.astype(jnp.bfloat16),
                 b.astype(jnp.float32)]
    args += [params["fc_w_t"].astype(jnp.bfloat16),
             params["fc_b"].astype(jnp.float32)]

    vmem_spec = pl.BlockSpec(memory_space=pltpu.MemorySpace.VMEM)
    kernel = make_fused_lstm_kernel(L, S, B, H)
    return pl.pallas_call(
        kernel,
        out_shape=jax.ShapeDtypeStruct((L * B, O), jnp.float32),
        in_specs=[vmem_spec] * len(args),
        out_specs=vmem_spec,
    )(*args)


# ----------------------------------------------------------------------------
# Pure-JAX f32 reference (PyTorch semantics) for a correctness check
# ----------------------------------------------------------------------------
def lstm_forward_ref(x, params):
    x_sbd = jnp.transpose(x, (1, 0, 2)).astype(jnp.float32)
    h_lasts = []
    layer_in = x_sbd
    for (w_ih_t, w_hh_t, bias) in params["lstm"]:
        B = layer_in.shape[1]
        H = w_hh_t.shape[0]

        def step(carry, x_t):
            h, c = carry
            gates = x_t @ w_ih_t + h @ w_hh_t + bias[0]
            i = jax.nn.sigmoid(gates[:, 0 * H:1 * H])
            f = jax.nn.sigmoid(gates[:, 1 * H:2 * H])
            g = jnp.tanh(gates[:, 2 * H:3 * H])
            o = jax.nn.sigmoid(gates[:, 3 * H:4 * H])
            c_new = f * c + i * g
            h_new = o * jnp.tanh(c_new)
            return (h_new, c_new), h_new

        init = (jnp.zeros((B, H), jnp.float32), jnp.zeros((B, H), jnp.float32))
        (h_fin, _), hseq = jax.lax.scan(step, init, layer_in)
        h_lasts.append(h_fin)
        layer_in = hseq
    H = params["lstm"][0][1].shape[0]
    h_flat = jnp.stack(h_lasts, axis=0).reshape(-1, H)
    return h_flat @ params["fc_w_t"] + params["fc_b"]


# ----------------------------------------------------------------------------
# Deterministic parameter init (PyTorch-like uniform(-1/sqrt(H), 1/sqrt(H)))
# ----------------------------------------------------------------------------
def init_params(key, input_size, hidden_size, num_layers, output_size):
    H = hidden_size
    bound = 1.0 / jnp.sqrt(jnp.float32(H))
    params = {"lstm": []}
    for layer in range(num_layers):
        d_in = input_size if layer == 0 else hidden_size
        key, k1, k2, k3, k4 = jax.random.split(key, 5)
        w_ih = jax.random.uniform(k1, (4 * H, d_in), jnp.float32, -bound, bound)
        w_hh = jax.random.uniform(k2, (4 * H, H), jnp.float32, -bound, bound)
        b_ih = jax.random.uniform(k3, (4 * H,), jnp.float32, -bound, bound)
        b_hh = jax.random.uniform(k4, (4 * H,), jnp.float32, -bound, bound)
        params["lstm"].append(
            (w_ih.T, w_hh.T, (b_ih + b_hh).reshape(1, 4 * H))
        )
    key, k5, k6 = jax.random.split(key, 3)
    fb = 1.0 / jnp.sqrt(jnp.float32(H))
    w_fc = jax.random.uniform(k5, (output_size, H), jnp.float32, -fb, fb)
    b_fc = jax.random.uniform(k6, (output_size,), jnp.float32, -fb, fb)
    params["fc_w_t"] = w_fc.T
    params["fc_b"] = b_fc.reshape(1, output_size)
    return params


if __name__ == "__main__":
    # Small shapes consistent with the module's forward:
    # batch=2, seq=8, input_size=16, hidden_size=32, num_layers=2, output=4
    batch, seq, input_size, hidden_size, num_layers, output_size = 2, 8, 16, 32, 2, 4

    key = jax.random.PRNGKey(0)
    key, kx, kp = jax.random.split(key, 3)
    x = jax.random.normal(kx, (batch, seq, input_size), jnp.float32)
    params = init_params(kp, input_size, hidden_size, num_layers, output_size)

    out = jax.block_until_ready(lstm_forward(x, params))
    ref = jax.block_until_ready(lstm_forward_ref(x, params))

    assert out.shape == (num_layers * batch, output_size), out.shape
    # Tolerance loosened vs. the pure-f32 version: MXU operands are bf16 now
    # (accumulation still f32); observed error is O(1e-2) worst case.
    assert jnp.allclose(out, ref, atol=3e-2, rtol=3e-2), (
        "mismatch vs reference: max abs diff %e" % float(jnp.max(jnp.abs(out - ref)))
    )

    print("KERNEL_OK")
</pallas_src>

<mosaic_0001>
module attributes {stable_mosaic.version = 11 : i64} {
  func.func @kernel(%arg0: memref<16x16xbf16, #tpu.memory_space<vmem>>, %arg1: memref<16x128xbf16, #tpu.memory_space<vmem>>, %arg2: memref<32x128xbf16, #tpu.memory_space<vmem>>, %arg3: memref<1x128xf32, #tpu.memory_space<vmem>>, %arg4: memref<32x128xbf16, #tpu.memory_space<vmem>>, %arg5: memref<32x128xbf16, #tpu.memory_space<vmem>>, %arg6: memref<1x128xf32, #tpu.memory_space<vmem>>, %arg7: memref<32x4xbf16, #tpu.memory_space<vmem>>, %arg8: memref<1x4xf32, #tpu.memory_space<vmem>>, %arg9: memref<4x4xf32, #tpu.memory_space<vmem>>) attributes {dimension_semantics = [], scalar_prefetch = 0 : i64, scratch_operands = 0 : i64, tpu.core_type = #tpu.core_type<tc>} {
    %c0 = arith.constant 0 : index
    %c0_0 = arith.constant 0 : index
    %0 = vector.load %arg1[%c0, %c0_0] : memref<16x128xbf16, #tpu.memory_space<vmem>>, vector<16x128xbf16>
    %c0_1 = arith.constant 0 : index
    %c0_2 = arith.constant 0 : index
    %1 = vector.load %arg4[%c0_1, %c0_2] : memref<32x128xbf16, #tpu.memory_space<vmem>>, vector<32x128xbf16>
    %c0_3 = arith.constant 0 : index
    %c0_4 = arith.constant 0 : index
    %2 = vector.load %arg2[%c0_3, %c0_4] : memref<32x128xbf16, #tpu.memory_space<vmem>>, vector<32x128xbf16>
    %c0_5 = arith.constant 0 : index
    %c0_6 = arith.constant 0 : index
    %3 = vector.load %arg5[%c0_5, %c0_6] : memref<32x128xbf16, #tpu.memory_space<vmem>>, vector<32x128xbf16>
    %c0_7 = arith.constant 0 : index
    %c0_8 = arith.constant 0 : index
    %4 = vector.load %arg3[%c0_7, %c0_8] : memref<1x128xf32, #tpu.memory_space<vmem>>, vector<1x128xf32>
    %c0_9 = arith.constant 0 : index
    %c0_10 = arith.constant 0 : index
    %5 = vector.load %arg6[%c0_9, %c0_10] : memref<1x128xf32, #tpu.memory_space<vmem>>, vector<1x128xf32>
    %c0_11 = arith.constant 0 : index
    %c0_12 = arith.constant 0 : index
    %6 = vector.load %arg0[%c0_11, %c0_12] : memref<16x16xbf16, #tpu.memory_space<vmem>>, vector<16x16xbf16>
    %cst = arith.constant dense<0.000000e+00> : vector<16x128xf32>
    %7 = tpu.matmul %6, %0, %cst {dimension_numbers = #tpu.dot_dimension_numbers<[1], [0], [0], [1], [0, 0, 1, 1], [], []>} : vector<16x16xbf16>, vector<16x128xbf16>, vector<16x128xf32> -> vector<16x128xf32>
    %8 = vector.broadcast %4 : vector<1x128xf32> to vector<16x128xf32>
    %9 = arith.addf %7, %8 : vector<16x128xf32>
    %10 = vector.extract_strided_slice %9 {offsets = [0, 0], sizes = [2, 128], strides = [1, 1]} : vector<16x128xf32> to vector<2x128xf32>
    %11 = arith.negf %10 : vector<2x128xf32>
    %12 = math.exp %11 : vector<2x128xf32>
    %cst_13 = arith.constant 1.000000e+00 : f32
    %13 = vector.broadcast %cst_13 : f32 to vector<2x128xf32>
    %14 = arith.addf %13, %12 : vector<2x128xf32>
    %15 = arith.divf %13, %14 : vector<2x128xf32>
    %16 = math.tanh %10 : vector<2x128xf32>
    %17 = vector.extract_strided_slice %15 {offsets = [0, 0], sizes = [2, 32], strides = [1, 1]} : vector<2x128xf32> to vector<2x32xf32>
    %18 = vector.extract_strided_slice %16 {offsets = [0, 64], sizes = [2, 32], strides = [1, 1]} : vector<2x128xf32> to vector<2x32xf32>
    %19 = vector.extract_strided_slice %15 {offsets = [0, 96], sizes = [2, 32], strides = [1, 1]} : vector<2x128xf32> to vector<2x32xf32>
    %20 = arith.mulf %17, %18 : vector<2x32xf32>
    %21 = math.tanh %20 : vector<2x32xf32>
    %22 = arith.mulf %19, %21 : vector<2x32xf32>
    %23 = vector.extract_strided_slice %9 {offsets = [2, 0], sizes = [2, 128], strides = [1, 1]} : vector<16x128xf32> to vector<2x128xf32>
    %24 = arith.truncf %22 : vector<2x32xf32> to vector<2x32xbf16>
    %cst_14 = arith.constant dense<0.000000e+00> : vector<2x128xf32>
    %25 = tpu.matmul %24, %2, %cst_14 {dimension_numbers = #tpu.dot_dimension_numbers<[1], [0], [0], [1], [0, 0, 1, 1], [], []>} : vector<2x32xbf16>, vector<32x128xbf16>, vector<2x128xf32> -> vector<2x128xf32>
    %26 = arith.addf %23, %25 : vector<2x128xf32>
    %27 = arith.negf %26 : vector<2x128xf32>
    %28 = math.exp %27 : vector<2x128xf32>
    %cst_15 = arith.constant 1.000000e+00 : f32
    %29 = vector.broadcast %cst_15 : f32 to vector<2x128xf32>
    %30 = arith.addf %29, %28 : vector<2x128xf32>
    %31 = arith.divf %29, %30 : vector<2x128xf32>
    %32 = math.tanh %26 : vector<2x128xf32>
    %33 = vector.extract_strided_slice %31 {offsets = [0, 0], sizes = [2, 32], strides = [1, 1]} : vector<2x128xf32> to vector<2x32xf32>
    %34 = vector.extract_strided_slice %31 {offsets = [0, 32], sizes = [2, 32], strides = [1, 1]} : vector<2x128xf32> to vector<2x32xf32>
    %35 = vector.extract_strided_slice %32 {offsets = [0, 64], sizes = [2, 32], strides = [1, 1]} : vector<2x128xf32> to vector<2x32xf32>
    %36 = vector.extract_strided_slice %31 {offsets = [0, 96], sizes = [2, 32], strides = [1, 1]} : vector<2x128xf32> to vector<2x32xf32>
    %37 = arith.mulf %34, %20 : vector<2x32xf32>
    %38 = arith.mulf %33, %35 : vector<2x32xf32>
    %39 = arith.addf %37, %38 : vector<2x32xf32>
    %40 = math.tanh %39 : vector<2x32xf32>
    %41 = arith.mulf %36, %40 : vector<2x32xf32>
    %42 = arith.truncf %22 : vector<2x32xf32> to vector<2x32xbf16>
    %cst_16 = arith.constant dense<0.000000e+00> : vector<2x128xf32>
    %43 = tpu.matmul %42, %1, %cst_16 {dimension_numbers = #tpu.dot_dimension_numbers<[1], [0], [0], [1], [0, 0, 1, 1], [], []>} : vector<2x32xbf16>, vector<32x128xbf16>, vector<2x128xf32> -> vector<2x128xf32>
    %44 = vector.broadcast %5 : vector<1x128xf32> to vector<2x128xf32>
    %45 = arith.addf %43, %44 : vector<2x128xf32>
    %46 = arith.negf %45 : vector<2x128xf32>
    %47 = math.exp %46 : vector<2x128xf32>
    %cst_17 = arith.constant 1.000000e+00 : f32
    %48 = vector.broadcast %cst_17 : f32 to vector<2x128xf32>
    %49 = arith.addf %48, %47 : vector<2x128xf32>
    %50 = arith.divf %48, %49 : vector<2x128xf32>
    %51 = math.tanh %45 : vector<2x128xf32>
    %52 = vector.extract_strided_slice %50 {offsets = [0, 0], sizes = [2, 32], strides = [1, 1]} : vector<2x128xf32> to vector<2x32xf32>
    %53 = vector.extract_strided_slice %51 {offsets = [0, 64], sizes = [2, 32], strides = [1, 1]} : vector<2x128xf32> to vector<2x32xf32>
    %54 = vector.extract_strided_slice %50 {offsets = [0, 96], sizes = [2, 32], strides = [1, 1]} : vector<2x128xf32> to vector<2x32xf32>
    %55 = arith.mulf %52, %53 : vector<2x32xf32>
    %56 = math.tanh %55 : vector<2x32xf32>
    %57 = arith.mulf %54, %56 : vector<2x32xf32>
    %58 = vector.extract_strided_slice %9 {offsets = [4, 0], sizes = [2, 128], strides = [1, 1]} : vector<16x128xf32> to vector<2x128xf32>
    %59 = arith.truncf %41 : vector<2x32xf32> to vector<2x32xbf16>
    %cst_18 = arith.constant dense<0.000000e+00> : vector<2x128xf32>
    %60 = tpu.matmul %59, %2, %cst_18 {dimension_numbers = #tpu.dot_dimension_numbers<[1], [0], [0], [1], [0, 0, 1, 1], [], []>} : vector<2x32xbf16>, vector<32x128xbf16>, vector<2x128xf32> -> vector<2x128xf32>
    %61 = arith.addf %58, %60 : vector<2x128xf32>
    %62 = arith.negf %61 : vector<2x128xf32>
    %63 = math.exp %62 : vector<2x128xf32>
    %cst_19 = arith.constant 1.000000e+00 : f32
    %64 = vector.broadcast %cst_19 : f32 to vector<2x128xf32>
    %65 = arith.addf %64, %63 : vector<2x128xf32>
    %66 = arith.divf %64, %65 : vector<2x128xf32>
    %67 = math.tanh %61 : vector<2x128xf32>
    %68 = vector.extract_strided_slice %66 {offsets = [0, 0], sizes = [2, 32], strides = [1, 1]} : vector<2x128xf32> to vector<2x32xf32>
    %69 = vector.extract_strided_slice %66 {offsets = [0, 32], sizes = [2, 32], strides = [1, 1]} : vector<2x128xf32> to vector<2x32xf32>
    %70 = vector.extract_strided_slice %67 {offsets = [0, 64], sizes = [2, 32], strides = [1, 1]} : vector<2x128xf32> to vector<2x32xf32>
    %71 = vector.extract_strided_slice %66 {offsets = [0, 96], sizes = [2, 32], strides = [1, 1]} : vector<2x128xf32> to vector<2x32xf32>
    %72 = arith.mulf %69, %39 : vector<2x32xf32>
    %73 = arith.mulf %68, %70 : vector<2x32xf32>
    %74 = arith.addf %72, %73 : vector<2x32xf32>
    %75 = math.tanh %74 : vector<2x32xf32>
    %76 = arith.mulf %71, %75 : vector<2x32xf32>
    %77 = arith.truncf %41 : vector<2x32xf32> to vector<2x32xbf16>
    %cst_20 = arith.constant dense<0.000000e+00> : vector<2x128xf32>
    %78 = tpu.matmul %77, %1, %cst_20 {dimension_numbers = #tpu.dot_dimension_numbers<[1], [0], [0], [1], [0, 0, 1, 1], [], []>} : vector<2x32xbf16>, vector<32x128xbf16>, vector<2x128xf32> -> vector<2x128xf32>
    %79 = vector.broadcast %5 : vector<1x128xf32> to vector<2x128xf32>
    %80 = arith.addf %78, %79 : vector<2x128xf32>
    %81 = arith.truncf %57 : vector<2x32xf32> to vector<2x32xbf16>
    %cst_21 = arith.constant dense<0.000000e+00> : vector<2x128xf32>
    %82 = tpu.matmul %81, %3, %cst_21 {dimension_numbers = #tpu.dot_dimension_numbers<[1], [0], [0], [1], [0, 0, 1, 1], [], []>} : vector<2x32xbf16>, vector<32x128xbf16>, vector<2x128xf32> -> vector<2x128xf32>
    %83 = arith.addf %80, %82 : vector<2x128xf32>
    %84 = arith.negf %83 : vector<2x128xf32>
    %85 = math.exp %84 : vector<2x128xf32>
    %cst_22 = arith.constant 1.000000e+00 : f32
    %86 = vector.broadcast %cst_22 : f32 to vector<2x128xf32>
    %87 = arith.addf %86, %85 : vector<2x128xf32>
    %88 = arith.divf %86, %87 : vector<2x128xf32>
    %89 = math.tanh %83 : vector<2x128xf32>
    %90 = vector.extract_strided_slice %88 {offsets = [0, 0], sizes = [2, 32], strides = [1, 1]} : vector<2x128xf32> to vector<2x32xf32>
    %91 = vector.extract_strided_slice %88 {offsets = [0, 32], sizes = [2, 32], strides = [1, 1]} : vector<2x128xf32> to vector<2x32xf32>
    %92 = vector.extract_strided_slice %89 {offsets = [0, 64], sizes = [2, 32], strides = [1, 1]} : vector<2x128xf32> to vector<2x32xf32>
    %93 = vector.extract_strided_slice %88 {offsets = [0, 96], sizes = [2, 32], strides = [1, 1]} : vector<2x128xf32> to vector<2x32xf32>
    %94 = arith.mulf %91, %55 : vector<2x32xf32>
    %95 = arith.mulf %90, %92 : vector<2x32xf32>
    %96 = arith.addf %94, %95 : vector<2x32xf32>
    %97 = math.tanh %96 : vector<2x32xf32>
    %98 = arith.mulf %93, %97 : vector<2x32xf32>
    %99 = vector.extract_strided_slice %9 {offsets = [6, 0], sizes = [2, 128], strides = [1, 1]} : vector<16x128xf32> to vector<2x128xf32>
    %100 = arith.truncf %76 : vector<2x32xf32> to vector<2x32xbf16>
    %cst_23 = arith.constant dense<0.000000e+00> : vector<2x128xf32>
    %101 = tpu.matmul %100, %2, %cst_23 {dimension_numbers = #tpu.dot_dimension_numbers<[1], [0], [0], [1], [0, 0, 1, 1], [], []>} : vector<2x32xbf16>, vector<32x128xbf16>, vector<2x128xf32> -> vector<2x128xf32>
    %102 = arith.addf %99, %101 : vector<2x128xf32>
    %103 = arith.negf %102 : vector<2x128xf32>
    %104 = math.exp %103 : vector<2x128xf32>
    %cst_24 = arith.constant 1.000000e+00 : f32
    %105 = vector.broadcast %cst_24 : f32 to vector<2x128xf32>
    %106 = arith.addf %105, %104 : vector<2x128xf32>
    %107 = arith.divf %105, %106 : vector<2x128xf32>
    %108 = math.tanh %102 : vector<2x128xf32>
    %109 = vector.extract_strided_slice %107 {offsets = [0, 0], sizes = [2, 32], strides = [1, 1]} : vector<2x128xf32> to vector<2x32xf32>
    %110 = vector.extract_strided_slice %107 {offsets = [0, 32], sizes = [2, 32], strides = [1, 1]} : vector<2x128xf32> to vector<2x32xf32>
    %111 = vector.extract_strided_slice %108 {offsets = [0, 64], sizes = [2, 32], strides = [1, 1]} : vector<2x128xf32> to vector<2x32xf32>
    %112 = vector.extract_strided_slice %107 {offsets = [0, 96], sizes = [2, 32], strides = [1, 1]} : vector<2x128xf32> to vector<2x32xf32>
    %113 = arith.mulf %110, %74 : vector<2x32xf32>
    %114 = arith.mulf %109, %111 : vector<2x32xf32>
    %115 = arith.addf %113, %114 : vector<2x32xf32>
    %116 = math.tanh %115 : vector<2x32xf32>
    %117 = arith.mulf %112, %116 : vector<2x32xf32>
    %118 = arith.truncf %76 : vector<2x32xf32> to vector<2x32xbf16>
    %cst_25 = arith.constant dense<0.000000e+00> : vector<2x128xf32>
    %119 = tpu.matmul %118, %1, %cst_25 {dimension_numbers = #tpu.dot_dimension_numbers<[1], [0], [0], [1], [0, 0, 1, 1], [], []>} : vector<2x32xbf16>, vector<32x128xbf16>, vector<2x128xf32> -> vector<2x128xf32>
    %120 = vector.broadcast %5 : vector<1x128xf32> to vector<2x128xf32>
    %121 = arith.addf %119, %120 : vector<2x128xf32>
    %122 = arith.truncf %98 : vector<2x32xf32> to vector<2x32xbf16>
    %cst_26 = arith.constant dense<0.000000e+00> : vector<2x128xf32>
    %123 = tpu.matmul %122, %3, %cst_26 {dimension_numbers = #tpu.dot_dimension_numbers<[1], [0], [0], [1], [0, 0, 1, 1], [], []>} : vector<2x32xbf16>, vector<32x128xbf16>, vector<2x128xf32> -> vector<2x128xf32>
    %124 = arith.addf %121, %123 : vector<2x128xf32>
    %125 = arith.negf %124 : vector<2x128xf32>
    %126 = math.exp %125 : vector<2x128xf32>
    %cst_27 = arith.constant 1.000000e+00 : f32
    %127 = vector.broadcast %cst_27 : f32 to vector<2x128xf32>
    %128 = arith.addf %127, %126 : vector<2x128xf32>
    %129 = arith.divf %127, %128 : vector<2x128xf32>
    %130 = math.tanh %124 : vector<2x128xf32>
    %131 = vector.extract_strided_slice %129 {offsets = [0, 0], sizes = [2, 32], strides = [1, 1]} : vector<2x128xf32> to vector<2x32xf32>
    %132 = vector.extract_strided_slice %129 {offsets = [0, 32], sizes = [2, 32], strides = [1, 1]} : vector<2x128xf32> to vector<2x32xf32>
    %133 = vector.extract_strided_slice %130 {offsets = [0, 64], sizes = [2, 32], strides = [1, 1]} : vector<2x128xf32> to vector<2x32xf32>
    %134 = vector.extract_strided_slice %129 {offsets = [0, 96], sizes = [2, 32], strides = [1, 1]} : vector<2x128xf32> to vector<2x32xf32>
    %135 = arith.mulf %132, %96 : vector<2x32xf32>
    %136 = arith.mulf %131, %133 : vector<2x32xf32>
    %137 = arith.addf %135, %136 : vector<2x32xf32>
    %138 = math.tanh %137 : vector<2x32xf32>
    %139 = arith.mulf %134, %138 : vector<2x32xf32>
    %140 = vector.extract_strided_slice %9 {offsets = [8, 0], sizes = [2, 128], strides = [1, 1]} : vector<16x128xf32> to vector<2x128xf32>
    %141 = arith.truncf %117 : vector<2x32xf32> to vector<2x32xbf16>
    %cst_28 = arith.constant dense<0.000000e+00> : vector<2x128xf32>
    %142 = tpu.matmul %141, %2, %cst_28 {dimension_numbers = #tpu.dot_dimension_numbers<[1], [0], [0], [1], [0, 0, 1, 1], [], []>} : vector<2x32xbf16>, vector<32x128xbf16>, vector<2x128xf32> -> vector<2x128xf32>
    %143 = arith.addf %140, %142 : vector<2x128xf32>
    %144 = arith.negf %143 : vector<2x128xf32>
    %145 = math.exp %144 : vector<2x128xf32>
    %cst_29 = arith.constant 1.000000e+00 : f32
    %146 = vector.broadcast %cst_29 : f32 to vector<2x128xf32>
    %147 = arith.addf %146, %145 : vector<2x128xf32>
    %148 = arith.divf %146, %147 : vector<2x128xf32>
    %149 = math.tanh %143 : vector<2x128xf32>
    %150 = vector.extract_strided_slice %148 {offsets = [0, 0], sizes = [2, 32], strides = [1, 1]} : vector<2x128xf32> to vector<2x32xf32>
    %151 = vector.extract_strided_slice %148 {offsets = [0, 32], sizes = [2, 32], strides = [1, 1]} : vector<2x128xf32> to vector<2x32xf32>
    %152 = vector.extract_strided_slice %149 {offsets = [0, 64], sizes = [2, 32], strides = [1, 1]} : vector<2x128xf32> to vector<2x32xf32>
    %153 = vector.extract_strided_slice %148 {offsets = [0, 96], sizes = [2, 32], strides = [1, 1]} : vector<2x128xf32> to vector<2x32xf32>
    %154 = arith.mulf %151, %115 : vector<2x32xf32>
    %155 = arith.mulf %150, %152 : vector<2x32xf32>
    %156 = arith.addf %154, %155 : vector<2x32xf32>
    %157 = math.tanh %156 : vector<2x32xf32>
    %158 = arith.mulf %153, %157 : vector<2x32xf32>
    %159 = arith.truncf %117 : vector<2x32xf32> to vector<2x32xbf16>
    %cst_30 = arith.constant dense<0.000000e+00> : vector<2x128xf32>
    %160 = tpu.matmul %159, %1, %cst_30 {dimension_numbers = #tpu.dot_dimension_numbers<[1], [0], [0], [1], [0, 0, 1, 1], [], []>} : vector<2x32xbf16>, vector<32x128xbf16>, vector<2x128xf32> -> vector<2x128xf32>
    %161 = vector.broadcast %5 : vector<1x128xf32> to vector<2x128xf32>
    %162 = arith.addf %160, %161 : vector<2x128xf32>
    %163 = arith.truncf %139 : vector<2x32xf32> to vector<2x32xbf16>
    %cst_31 = arith.constant dense<0.000000e+00> : vector<2x128xf32>
    %164 = tpu.matmul %163, %3, %cst_31 {dimension_numbers = #tpu.dot_dimension_numbers<[1], [0], [0], [1], [0, 0, 1, 1], [], []>} : vector<2x32xbf16>, vector<32x128xbf16>, vector<2x128xf32> -> vector<2x128xf32>
    %165 = arith.addf %162, %164 : vector<2x128xf32>
    %166 = arith.negf %165 : vector<2x128xf32>
    %167 = math.exp %166 : vector<2x128xf32>
    %cst_32 = arith.constant 1.000000e+00 : f32
    %168 = vector.broadcast %cst_32 : f32 to vector<2x128xf32>
    %169 = arith.addf %168, %167 : vector<2x128xf32>
    %170 = arith.divf %168, %169 : vector<2x128xf32>
    %171 = math.tanh %165 : vector<2x128xf32>
    %172 = vector.extract_strided_slice %170 {offsets = [0, 0], sizes = [2, 32], strides = [1, 1]} : vector<2x128xf32> to vector<2x32xf32>
    %173 = vector.extract_strided_slice %170 {offsets = [0, 32], sizes = [2, 32], strides = [1, 1]} : vector<2x128xf32> to vector<2x32xf32>
    %174 = vector.extract_strided_slice %171 {offsets = [0, 64], sizes = [2, 32], strides = [1, 1]} : vector<2x128xf32> to vector<2x32xf32>
    %175 = vector.extract_strided_slice %170 {offsets = [0, 96], sizes = [2, 32], strides = [1, 1]} : vector<2x128xf32> to vector<2x32xf32>
    %176 = arith.mulf %173, %137 : vector<2x32xf32>
    %177 = arith.mulf %172, %174 : vector<2x32xf32>
    %178 = arith.addf %176, %177 : vector<2x32xf32>
    %179 = math.tanh %178 : vector<2x32xf32>
    %180 = arith.mulf %175, %179 : vector<2x32xf32>
    %181 = vector.extract_strided_slice %9 {offsets = [10, 0], sizes = [2, 128], strides = [1, 1]} : vector<16x128xf32> to vector<2x128xf32>
    %182 = arith.truncf %158 : vector<2x32xf32> to vector<2x32xbf16>
    %cst_33 = arith.constant dense<0.000000e+00> : vector<2x128xf32>
    %183 = tpu.matmul %182, %2, %cst_33 {dimension_numbers = #tpu.dot_dimension_numbers<[1], [0], [0], [1], [0, 0, 1, 1], [], []>} : vector<2x32xbf16>, vector<32x128xbf16>, vector<2x128xf32> -> vector<2x128xf32>
    %184 = arith.addf %181, %183 : vector<2x128xf32>
    %185 = arith.negf %184 : vector<2x128xf32>
    %186 = math.exp %185 : vector<2x128xf32>
    %cst_34 = arith.constant 1.000000e+00 : f32
    %187 = vector.broadcast %cst_34 : f32 to vector<2x128xf32>
    %188 = arith.addf %187, %186 : vector<2x128xf32>
    %189 = arith.divf %187, %188 : vector<2x128xf32>
    %190 = math.tanh %184 : vector<2x128xf32>
    %191 = vector.extract_strided_slice %189 {offsets = [0, 0], sizes = [2, 32], strides = [1, 1]} : vector<2x128xf32> to vector<2x32xf32>
    %192 = vector.extract_strided_slice %189 {offsets = [0, 32], sizes = [2, 32], strides = [1, 1]} : vector<2x128xf32> to vector<2x32xf32>
    %193 = vector.extract_strided_slice %190 {offsets = [0, 64], sizes = [2, 32], strides = [1, 1]} : vector<2x128xf32> to vector<2x32xf32>
    %194 = vector.extract_strided_slice %189 {offsets = [0, 96], sizes = [2, 32], strides = [1, 1]} : vector<2x128xf32> to vector<2x32xf32>
    %195 = arith.mulf %192, %156 : vector<2x32xf32>
    %196 = arith.mulf %191, %193 : vector<2x32xf32>
    %197 = arith.addf %195, %196 : vector<2x32xf32>
    %198 = math.tanh %197 : vector<2x32xf32>
    %199 = arith.mulf %194, %198 : vector<2x32xf32>
    %200 = arith.truncf %158 : vector<2x32xf32> to vector<2x32xbf16>
    %cst_35 = arith.constant dense<0.000000e+00> : vector<2x128xf32>
    %201 = tpu.matmul %200, %1, %cst_35 {dimension_numbers = #tpu.dot_dimension_numbers<[1], [0], [0], [1], [0, 0, 1, 1], [], []>} : vector<2x32xbf16>, vector<32x128xbf16>, vector<2x128xf32> -> vector<2x128xf32>
    %202 = vector.broadcast %5 : vector<1x128xf32> to vector<2x128xf32>
    %203 = arith.addf %201, %202 : vector<2x128xf32>
    %204 = arith.truncf %180 : vector<2x32xf32> to vector<2x32xbf16>
    %cst_36 = arith.constant dense<0.000000e+00> : vector<2x128xf32>
    %205 = tpu.matmul %204, %3, %cst_36 {dimension_numbers = #tpu.dot_dimension_numbers<[1], [0], [0], [1], [0, 0, 1, 1], [], []>} : vector<2x32xbf16>, vector<32x128xbf16>, vector<2x128xf32> -> vector<2x128xf32>
    %206 = arith.addf %203, %205 : vector<2x128xf32>
    %207 = arith.negf %206 : vector<2x128xf32>
    %208 = math.exp %207 : vector<2x128xf32>
    %cst_37 = arith.constant 1.000000e+00 : f32
    %209 = vector.broadcast %cst_37 : f32 to vector<2x128xf32>
    %210 = arith.addf %209, %208 : vector<2x128xf32>
    %211 = arith.divf %209, %210 : vector<2x128xf32>
    %212 = math.tanh %206 : vector<2x128xf32>
    %213 = vector.extract_strided_slice %211 {offsets = [0, 0], sizes = [2, 32], strides = [1, 1]} : vector<2x128xf32> to vector<2x32xf32>
    %214 = vector.extract_strided_slice %211 {offsets = [0, 32], sizes = [2, 32], strides = [1, 1]} : vector<2x128xf32> to vector<2x32xf32>
    %215 = vector.extract_strided_slice %212 {offsets = [0, 64], sizes = [2, 32], strides = [1, 1]} : vector<2x128xf32> to vector<2x32xf32>
    %216 = vector.extract_strided_slice %211 {offsets = [0, 96], sizes = [2, 32], strides = [1, 1]} : vector<2x128xf32> to vector<2x32xf32>
    %217 = arith.mulf %214, %178 : vector<2x32xf32>
    %218 = arith.mulf %213, %215 : vector<2x32xf32>
    %219 = arith.addf %217, %218 : vector<2x32xf32>
    %220 = math.tanh %219 : vector<2x32xf32>
    %221 = arith.mulf %216, %220 : vector<2x32xf32>
    %222 = vector.extract_strided_slice %9 {offsets = [12, 0], sizes = [2, 128], strides = [1, 1]} : vector<16x128xf32> to vector<2x128xf32>
    %223 = arith.truncf %199 : vector<2x32xf32> to vector<2x32xbf16>
    %cst_38 = arith.constant dense<0.000000e+00> : vector<2x128xf32>
    %224 = tpu.matmul %223, %2, %cst_38 {dimension_numbers = #tpu.dot_dimension_numbers<[1], [0], [0], [1], [0, 0, 1, 1], [], []>} : vector<2x32xbf16>, vector<32x128xbf16>, vector<2x128xf32> -> vector<2x128xf32>
    %225 = arith.addf %222, %224 : vector<2x128xf32>
    %226 = arith.negf %225 : vector<2x128xf32>
    %227 = math.exp %226 : vector<2x128xf32>
    %cst_39 = arith.constant 1.000000e+00 : f32
    %228 = vector.broadcast %cst_39 : f32 to vector<2x128xf32>
    %229 = arith.addf %228, %227 : vector<2x128xf32>
    %230 = arith.divf %228, %229 : vector<2x128xf32>
    %231 = math.tanh %225 : vector<2x128xf32>
    %232 = vector.extract_strided_slice %230 {offsets = [0, 0], sizes = [2, 32], strides = [1, 1]} : vector<2x128xf32> to vector<2x32xf32>
    %233 = vector.extract_strided_slice %230 {offsets = [0, 32], sizes = [2, 32], strides = [1, 1]} : vector<2x128xf32> to vector<2x32xf32>
    %234 = vector.extract_strided_slice %231 {offsets = [0, 64], sizes = [2, 32], strides = [1, 1]} : vector<2x128xf32> to vector<2x32xf32>
    %235 = vector.extract_strided_slice %230 {offsets = [0, 96], sizes = [2, 32], strides = [1, 1]} : vector<2x128xf32> to vector<2x32xf32>
    %236 = arith.mulf %233, %197 : vector<2x32xf32>
    %237 = arith.mulf %232, %234 : vector<2x32xf32>
    %238 = arith.addf %236, %237 : vector<2x32xf32>
    %239 = math.tanh %238 : vector<2x32xf32>
    %240 = arith.mulf %235, %239 : vector<2x32xf32>
    %241 = arith.truncf %199 : vector<2x32xf32> to vector<2x32xbf16>
    %cst_40 = arith.constant dense<0.000000e+00> : vector<2x128xf32>
    %242 = tpu.matmul %241, %1, %cst_40 {dimension_numbers = #tpu.dot_dimension_numbers<[1], [0], [0], [1], [0, 0, 1, 1], [], []>} : vector<2x32xbf16>, vector<32x128xbf16>, vector<2x128xf32> -> vector<2x128xf32>
    %243 = vector.broadcast %5 : vector<1x128xf32> to vector<2x128xf32>
    %244 = arith.addf %242, %243 : vector<2x128xf32>
    %245 = arith.truncf %221 : vector<2x32xf32> to vector<2x32xbf16>
    %cst_41 = arith.constant dense<0.000000e+00> : vector<2x128xf32>
    %246 = tpu.matmul %245, %3, %cst_41 {dimension_numbers = #tpu.dot_dimension_numbers<[1], [0], [0], [1], [0, 0, 1, 1], [], []>} : vector<2x32xbf16>, vector<32x128xbf16>, vector<2x128xf32> -> vector<2x128xf32>
    %247 = arith.addf %244, %246 : vector<2x128xf32>
    %248 = arith.negf %247 : vector<2x128xf32>
    %249 = math.exp %248 : vector<2x128xf32>
    %cst_42 = arith.constant 1.000000e+00 : f32
    %250 = vector.broadcast %cst_42 : f32 to vector<2x128xf32>
    %251 = arith.addf %250, %249 : vector<2x128xf32>
    %252 = arith.divf %250, %251 : vector<2x128xf32>
    %253 = math.tanh %247 : vector<2x128xf32>
    %254 = vector.extract_strided_slice %252 {offsets = [0, 0], sizes = [2, 32], strides = [1, 1]} : vector<2x128xf32> to vector<2x32xf32>
    %255 = vector.extract_strided_slice %252 {offsets = [0, 32], sizes = [2, 32], strides = [1, 1]} : vector<2x128xf32> to vector<2x32xf32>
    %256 = vector.extract_strided_slice %253 {offsets = [0, 64], sizes = [2, 32], strides = [1, 1]} : vector<2x128xf32> to vector<2x32xf32>
    %257 = vector.extract_strided_slice %252 {offsets = [0, 96], sizes = [2, 32], strides = [1, 1]} : vector<2x128xf32> to vector<2x32xf32>
    %258 = arith.mulf %255, %219 : vector<2x32xf32>
    %259 = arith.mulf %254, %256 : vector<2x32xf32>
    %260 = arith.addf %258, %259 : vector<2x32xf32>
    %261 = math.tanh %260 : vector<2x32xf32>
    %262 = arith.mulf %257, %261 : vector<2x32xf32>
    %263 = vector.extract_strided_slice %9 {offsets = [14, 0], sizes = [2, 128], strides = [1, 1]} : vector<16x128xf32> to vector<2x128xf32>
    %264 = arith.truncf %240 : vector<2x32xf32> to vector<2x32xbf16>
    %cst_43 = arith.constant dense<0.000000e+00> : vector<2x128xf32>
    %265 = tpu.matmul %264, %2, %cst_43 {dimension_numbers = #tpu.dot_dimension_numbers<[1], [0], [0], [1], [0, 0, 1, 1], [], []>} : vector<2x32xbf16>, vector<32x128xbf16>, vector<2x128xf32> -> vector<2x128xf32>
    %266 = arith.addf %263, %265 : vector<2x128xf32>
    %267 = arith.negf %266 : vector<2x128xf32>
    %268 = math.exp %267 : vector<2x128xf32>
    %cst_44 = arith.constant 1.000000e+00 : f32
    %269 = vector.broadcast %cst_44 : f32 to vector<2x128xf32>
    %270 = arith.addf %269, %268 : vector<2x128xf32>
    %271 = arith.divf %269, %270 : vector<2x128xf32>
    %272 = math.tanh %266 : vector<2x128xf32>
    %273 = vector.extract_strided_slice %271 {offsets = [0, 0], sizes = [2, 32], strides = [1, 1]} : vector<2x128xf32> to vector<2x32xf32>
    %274 = vector.extract_strided_slice %271 {offsets = [0, 32], sizes = [2, 32], strides = [1, 1]} : vector<2x128xf32> to vector<2x32xf32>
    %275 = vector.extract_strided_slice %272 {offsets = [0, 64], sizes = [2, 32], strides = [1, 1]} : vector<2x128xf32> to vector<2x32xf32>
    %276 = vector.extract_strided_slice %271 {offsets = [0, 96], sizes = [2, 32], strides = [1, 1]} : vector<2x128xf32> to vector<2x32xf32>
    %277 = arith.mulf %274, %238 : vector<2x32xf32>
    %278 = arith.mulf %273, %275 : vector<2x32xf32>
    %279 = arith.addf %277, %278 : vector<2x32xf32>
    %280 = math.tanh %279 : vector<2x32xf32>
    %281 = arith.mulf %276, %280 : vector<2x32xf32>
    %282 = arith.truncf %240 : vector<2x32xf32> to vector<2x32xbf16>
    %cst_45 = arith.constant dense<0.000000e+00> : vector<2x128xf32>
    %283 = tpu.matmul %282, %1, %cst_45 {dimension_numbers = #tpu.dot_dimension_numbers<[1], [0], [0], [1], [0, 0, 1, 1], [], []>} : vector<2x32xbf16>, vector<32x128xbf16>, vector<2x128xf32> -> vector<2x128xf32>
    %284 = vector.broadcast %5 : vector<1x128xf32> to vector<2x128xf32>
    %285 = arith.addf %283, %284 : vector<2x128xf32>
    %286 = arith.truncf %262 : vector<2x32xf32> to vector<2x32xbf16>
    %cst_46 = arith.constant dense<0.000000e+00> : vector<2x128xf32>
    %287 = tpu.matmul %286, %3, %cst_46 {dimension_numbers = #tpu.dot_dimension_numbers<[1], [0], [0], [1], [0, 0, 1, 1], [], []>} : vector<2x32xbf16>, vector<32x128xbf16>, vector<2x128xf32> -> vector<2x128xf32>
    %288 = arith.addf %285, %287 : vector<2x128xf32>
    %289 = arith.negf %288 : vector<2x128xf32>
    %290 = math.exp %289 : vector<2x128xf32>
    %cst_47 = arith.constant 1.000000e+00 : f32
    %291 = vector.broadcast %cst_47 : f32 to vector<2x128xf32>
    %292 = arith.addf %291, %290 : vector<2x128xf32>
    %293 = arith.divf %291, %292 : vector<2x128xf32>
    %294 = math.tanh %288 : vector<2x128xf32>
    %295 = vector.extract_strided_slice %293 {offsets = [0, 0], sizes = [2, 32], strides = [1, 1]} : vector<2x128xf32> to vector<2x32xf32>
    %296 = vector.extract_strided_slice %293 {offsets = [0, 32], sizes = [2, 32], strides = [1, 1]} : vector<2x128xf32> to vector<2x32xf32>
    %297 = vector.extract_strided_slice %294 {offsets = [0, 64], sizes = [2, 32], strides = [1, 1]} : vector<2x128xf32> to vector<2x32xf32>
    %298 = vector.extract_strided_slice %293 {offsets = [0, 96], sizes = [2, 32], strides = [1, 1]} : vector<2x128xf32> to vector<2x32xf32>
    %299 = arith.mulf %296, %260 : vector<2x32xf32>
    %300 = arith.mulf %295, %297 : vector<2x32xf32>
    %301 = arith.addf %299, %300 : vector<2x32xf32>
    %302 = math.tanh %301 : vector<2x32xf32>
    %303 = arith.mulf %298, %302 : vector<2x32xf32>
    %304 = arith.truncf %281 : vector<2x32xf32> to vector<2x32xbf16>
    %cst_48 = arith.constant dense<0.000000e+00> : vector<2x128xf32>
    %305 = tpu.matmul %304, %1, %cst_48 {dimension_numbers = #tpu.dot_dimension_numbers<[1], [0], [0], [1], [0, 0, 1, 1], [], []>} : vector<2x32xbf16>, vector<32x128xbf16>, vector<2x128xf32> -> vector<2x128xf32>
    %306 = vector.broadcast %5 : vector<1x128xf32> to vector<2x128xf32>
    %307 = arith.addf %305, %306 : vector<2x128xf32>
    %308 = arith.truncf %303 : vector<2x32xf32> to vector<2x32xbf16>
    %cst_49 = arith.constant dense<0.000000e+00> : vector<2x128xf32>
    %309 = tpu.matmul %308, %3, %cst_49 {dimension_numbers = #tpu.dot_dimension_numbers<[1], [0], [0], [1], [0, 0, 1, 1], [], []>} : vector<2x32xbf16>, vector<32x128xbf16>, vector<2x128xf32> -> vector<2x128xf32>
    %310 = arith.addf %307, %309 : vector<2x128xf32>
    %311 = arith.negf %310 : vector<2x128xf32>
    %312 = math.exp %311 : vector<2x128xf32>
    %cst_50 = arith.constant 1.000000e+00 : f32
    %313 = vector.broadcast %cst_50 : f32 to vector<2x128xf32>
    %314 = arith.addf %313, %312 : vector<2x128xf32>
    %315 = arith.divf %313, %314 : vector<2x128xf32>
    %316 = math.tanh %310 : vector<2x128xf32>
    %317 = vector.extract_strided_slice %315 {offsets = [0, 0], sizes = [2, 32], strides = [1, 1]} : vector<2x128xf32> to vector<2x32xf32>
    %318 = vector.extract_strided_slice %315 {offsets = [0, 32], sizes = [2, 32], strides = [1, 1]} : vector<2x128xf32> to vector<2x32xf32>
    %319 = vector.extract_strided_slice %316 {offsets = [0, 64], sizes = [2, 32], strides = [1, 1]} : vector<2x128xf32> to vector<2x32xf32>
    %320 = vector.extract_strided_slice %315 {offsets = [0, 96], sizes = [2, 32], strides = [1, 1]} : vector<2x128xf32> to vector<2x32xf32>
    %321 = arith.mulf %318, %301 : vector<2x32xf32>
    %322 = arith.mulf %317, %319 : vector<2x32xf32>
    %323 = arith.addf %321, %322 : vector<2x32xf32>
    %324 = math.tanh %323 : vector<2x32xf32>
    %325 = arith.mulf %320, %324 : vector<2x32xf32>
    %326 = tpu.concatenate %281, %325 in 0 : vector<2x32xf32>, vector<2x32xf32> -> vector<4x32xf32>
    %327 = arith.truncf %326 : vector<4x32xf32> to vector<4x32xbf16>
    %c0_51 = arith.constant 0 : index
    %c0_52 = arith.constant 0 : index
    %328 = vector.load %arg7[%c0_51, %c0_52] : memref<32x4xbf16, #tpu.memory_space<vmem>>, vector<32x4xbf16>
    %cst_53 = arith.constant dense<0.000000e+00> : vector<4x4xf32>
    %329 = tpu.matmul %327, %328, %cst_53 {dimension_numbers = #tpu.dot_dimension_numbers<[1], [0], [0], [1], [0, 0, 1, 1], [], []>} : vector<4x32xbf16>, vector<32x4xbf16>, vector<4x4xf32> -> vector<4x4xf32>
    %c0_54 = arith.constant 0 : index
    %c0_55 = arith.constant 0 : index
    %330 = vector.load %arg8[%c0_54, %c0_55] : memref<1x4xf32, #tpu.memory_space<vmem>>, vector<1x4xf32>
    %331 = vector.broadcast %330 : vector<1x4xf32> to vector<4x4xf32>
    %332 = arith.addf %329, %331 : vector<4x4xf32>
    %c0_56 = arith.constant 0 : index
    %c0_57 = arith.constant 0 : index
    %333 = vector.load %arg9[%c0_56, %c0_57] : memref<4x4xf32, #tpu.memory_space<vmem>>, vector<4x4xf32>
    tpu.vector_store %arg9[%c0_56, %c0_57], %332 {strides = array<i32>} : memref<4x4xf32, #tpu.memory_space<vmem>>, vector<4x4xf32>,
    return
  }
}

</mosaic_0001>

<bundles_post_ra>
// kernel: lstm_forward.1
= control target key start
LH: loop header
LB: loop body
LE: loop exit
PB: predicated region body
PF: predicated region fallthrough
CT: control target
= control target key end

     0   :  { %v2154_v1 = vmov 0.0   ;;  %vm2155_vm0 = vmmov 0   ;;  %vm69_vm1 = vcmask 130048   ;;  %s2563_s0 = inlined_call_operand.vmem [shape: bf16[16,16], index: 0, kind: input, shape index: {}]   ;;  %s2564_s1 = inlined_call_operand.vmem [shape: bf16[16,128], index: 1, kind: input, shape index: {}]   ;;  %s2565_s2 = inlined_call_operand.vmem [shape: bf16[32,128], index: 2, kind: input, shape index: {}]   ;;  %s2566_s3 = inlined_call_operand.vmem [shape: f32[1,128], index: 3, kind: input, shape index: {}]   ;;  %s2567_s4 = inlined_call_operand.vmem [shape: bf16[32,128], index: 4, kind: input, shape index: {}]   ;;  %s2568_s5 = inlined_call_operand.vmem [shape: bf16[32,128], index: 5, kind: input, shape index: {}]   ;;  %s2569_s6 = inlined_call_operand.vmem [shape: f32[1,128], index: 6, kind: input, shape index: {}]   ;;  %s2570_s7 = inlined_call_operand.vmem [shape: bf16[32,4], index: 7, kind: input, shape index: {}]   ;;  %s2571_s8 = inlined_call_operand.vmem [shape: f32[1,4], index: 8, kind: input, shape index: {}]   ;;  %s2572_s9 = inlined_call_operand.hbm [shape: f32[4,4], index: 9, kind: output, shape index: {}]  }
   0x1   :  { %v1993_v0 = vld [vmem:[%s2564_s1] sm:$0xff]   ;;  %1797 = vmatprep.subr.bf16.mxu0 %v2154_v1  ;;  %1803 = vmatprep.subr.bf16.mxu1 %v2154_v1 }
   0x2   :  { %v1994_v2 = vld [vmem:[%s2563_s0] sm:$0xff]   ;;  %1798 = vmatpush3.bf16.msra.mxu0 %v1993_v0  ;;  %1799 = vmatprep.mubr.msk.bf16.mxu0 %vm2155_vm0, %v2154_v1 }
   0x3   :  { %1811 = vmatprep.subr.bf16.mxu0 %v2154_v1  ;;  %1807 = vmatprep.mubr.msk.bf16.mxu1 %vm2155_vm0, %v2154_v1 }
   0x5   :  { %1800 = vmatmul.mubr.msk.bf16.vlgmr.msra.gmra.mxu0 %vm69_vm1, %v1994_v2 }
   0x6   :  { %1815 = vmatprep.mubr.msk.bf16.mxu0 %vm2155_vm0, %v2154_v1 }
   0x7   :  { %14 = vsyncpa [#allocation3], 0  ;;  %v1673_v3 = vld [vmem:[%s2566_s3] ss:$0 sm:$0xff]  ;;  %s2156_s13 = smov 64   ;;  %v2238_v17 = vld [vmem:[%s2565_s2 + $0x8] sm:$0xff]  }
   0x8   :  { %v2243_v18 = vld [vmem:[%s2567_s4 + $0x8] sm:$0xff]   ;;  %1804 = vmatpush3.bf16.msra.mxu1 %v2238_v17  ;;  %v2250_v19 = vld [vmem:[%s2565_s2] sm:$0xff]   ;;  %s2157_s2 = smov 96   ;;  %s2158_s21 = smov 32   ;;  %vm148_vm2 = vcmask 261120   ;;  %vm1585_vm3 = vcmask 1041408  }
   0x9   :  { %1812 = vmatpush3.bf16.msra.mxu0 %v2243_v18  ;;  %v2255_v20 = vld [vmem:[%s2567_s4] sm:$0xff]   ;;  %1805 = vmatprep.subr.bf16.mxu1 %v2154_v1  ;;  %s2159_s11 = smov [#allocation2]   ;;  %vm1657_vm4 = vcmask 27648  }
   0xa   :  { %1813 = vmatprep.subr.bf16.mxu0 %v2154_v1  ;;  %v2283_v27 = vld [vmem:[%s2569_s6] ss:$0 sm:$0xff]  ;;  %s1665_s12 = sshll.u32 %s2159_s11, 4  ;;  %s1666_s12 = int_to_ptr.vmem [resolvable:$true] %s1665_s12 }
   0xb   :  { %s2132_s1 = scalar_lea.vmem %s1666_s12, 64  ;;  %p2137_p1 = scmp.lt.s32.totalorder %s1666_s12, %s1666_s12 }
   0xc   :  { %1806 = vmatpush3.bf16.msra.mxu1 %v2250_v19  ;;  %p2133_p0 = scmp.ne.s32.totalorder %s1666_s12, %s2132_s1  ;;  %p2138_p2 = scmp.lt.s32.totalorder %s2132_s1, %s2132_s1 }
   0xd   :  { %1814 = vmatpush3.bf16.msra.mxu0 %v2255_v20  ;;  %1819 = vmatprep.subr.bf16.mxu1 %v2154_v1 }
   0xe   :  { %1827 = vmatprep.subr.bf16.mxu0 %v2154_v1  ;;  %p2139_p3 = por %p2138_p2, %p2137_p1 }
  0x10   :  { %p2140_p4 = pnand %p2139_p3, %p2133_p0 }
  0xc5   :  { %v107_v4 = vpop.f32.mrf.mxu0 }
  0xc6   :  { %v2228_v5 = vadd.f32 %v1673_v3, %v107_v4 }
  0xc7   :  { %v1801_v6 = vpop.f32.mrf.mxu0 }
  0xc8   :  { %2003 = vtanh.f32 %v2228_v5  ;;  %v1677_v11 = vmul.f32 -1.442695, %v2228_v5  ;;  %v2311_v6 = vld [vmem:[%s2568_s5] sm:$0xff]  }
  0xc9   :  { %v110_v7 = vpop.f32.mrf.mxu0 }
  0xca   :  { %v2231_v8 = vadd.f32 %v1673_v3, %v110_v7  ;;  %2005 = vpow2.f32 %v1677_v11  ;;  %v2303_v3 = vld [vmem:[%s2568_s5 + $0x8] sm:$0xff]  }
  0xcb   :  { %v1802_v9 = vpop.f32.mrf.mxu0 }
  0xd5   :  { %v2004_v10 = vpop.eup %2003 }
  0xd6   :  { %122 = vrot.lane.b32.xlu0 %v2004_v10, %s2156_s13 }
  0xd7   :  { %v2006_v12 = vpop.eup %2005 }
  0xd8   :  { %v117_v13 = vadd.f32 1.0, %v2006_v12 }
  0xda   :  { %2007 = vrcp.f32 %v117_v13 }
  0xe7   :  { %v2008_v14 = vpop.eup %2007 }
 0x148   :  { %v123_v15 = vpop.permute.xlu0 %122 }
 0x149   :  { %v125_v16 = vmul.f32 %v2008_v14, %v123_v15 }
 0x14b   :  { %2009 = vtanh.f32 %v125_v16  ;;  %v204_v22 = vrot.slane %v125_v16, 6 }
 0x158   :  { %v2010_v21 = vpop.eup %2009 }
 0x159   :  { %128 = vrot.lane.b32.xlu0 %v2010_v21, %s2157_s2 }
 0x15d   :  { %205 = vrot.lane.b32.xlu0 %v204_v22, %s2158_s21 }
 0x1cb   :  { %v129_v23 = vpop.permute.xlu0 %128 }
 0x1cc   :  { %v131_v24 = vmul.f32 %v2008_v14, %v129_v23 }
 0x1ce   :  { %v132_v25 = vpack.c.bf16 %v131_v24, %v131_v24 }
 0x1cf   :  { %v206_v47 = vpop.permute.xlu0 %205 }
 0x1d0   :  { %134 = vrot.lane.b32.xlu1 %v132_v25, %s2158_s21 }
 0x242   :  { %v135_v26 = vpop.permute.xlu1 %134 }
 0x243   :  { %1808 = vmatmul.mubr.msk.bf16.vlgmr.msra.gmra.mxu1 %vm148_vm2, %v135_v26  ;;  %1816 = vmatmul.mubr.msk.bf16.vlgmr.msra.gmra.mxu0 %vm148_vm2, %v135_v26 }
 0x244   :  { %1820 = vmatpush3.bf16.msra.mxu1 %v2238_v17  ;;  %1828 = vmatpush3.bf16.msra.mxu0 %v2243_v18 }
 0x245   :  { %1821 = vmatprep.subr.bf16.mxu1 %v2154_v1  ;;  %1829 = vmatprep.subr.bf16.mxu0 %v2154_v1 }
 0x246   :  { %1823 = vmatprep.mubr.msk.bf16.mxu1 %vm2155_vm0, %v2154_v1  ;;  %1831 = vmatprep.mubr.msk.bf16.mxu0 %vm2155_vm0, %v2154_v1 }
 0x248   :  { %1822 = vmatpush3.bf16.msra.mxu1 %v2250_v19  ;;  %1830 = vmatpush3.bf16.msra.mxu0 %v2255_v20 }
 0x249   :  { %1835 = vmatprep.subr.bf16.mxu1 %v2154_v1  ;;  %1843 = vmatprep.subr.bf16.mxu0 %v2154_v1 }
 0x303   :  { %v186_v28 = vpop.f32.mrf.mxu1  ;;  %v277_v29 = vpop.f32.mrf.mxu0 }
 0x304   :  { %v193_v30 = vrot.slane %v186_v28, 6  ;;  %v278_v31 = vadd.f32 %v2283_v27, %v277_v29 }
 0x305   :  { %v1809_v32 = vpop.f32.mrf.mxu1  ;;  %v1817_v33 = vpop.f32.mrf.mxu0 }
 0x306   :  { %v195_v34 = vadd.f32 %v193_v30, %v2228_v5  ;;  %2011 = vtanh.f32 %v278_v31  ;;  %v1686_v41 = vmul.f32 -1.442695, %v278_v31 }
 0x307   :  { %v189_v35 = vpop.f32.mrf.mxu1  ;;  %v280_v36 = vpop.f32.mrf.mxu0 }
 0x308   :  { %2013 = vtanh.f32 %v195_v34  ;;  %v1681_v42 = vmul.f32 -1.442695, %v195_v34 }
 0x309   :  { %v1810_v37 = vpop.f32.mrf.mxu1  ;;  %v1818_v38 = vpop.f32.mrf.mxu0  ;;  %2015 = vpow2.f32 %v1686_v41 }
 0x30a   :  { %2017 = vpow2.f32 %v1681_v42 }
 0x313   :  { %v2012_v39 = vpop.eup %2011 }
 0x314   :  { %291 = vrot.lane.b32.xlu0 %v2012_v39, %s2156_s13 }
 0x315   :  { %v2014_v40 = vpop.eup %2013 }
 0x316   :  { %210 = vrot.lane.b32.xlu1 %v2014_v40, %s2156_s13  ;;  %v2016_v43 = vpop.eup %2015 }
 0x317   :  { %v2018_v44 = vpop.eup %2017  ;;  %v286_v45 = vadd.f32 1.0, %v2016_v43 }
 0x318   :  { %v199_v46 = vadd.f32 1.0, %v2018_v44 }
 0x319   :  { %2019 = vrcp.f32 %v286_v45 }
 0x31a   :  { %2021 = vrcp.f32 %v199_v46 }
 0x326   :  { %v2020_v48 = vpop.eup %2019 }
 0x327   :  { %v2022_v51 = vpop.eup %2021 }
 0x328   :  { %v208_v55 = vmul.f32 %v2022_v51, %v206_v47 }
 0x386   :  { %v292_v49 = vpop.permute.xlu0 %291 }
 0x387   :  { %v2289_v50 = vmul.f32 %v2020_v48, %v292_v49 }
 0x388   :  { %v211_v52 = vpop.permute.xlu1 %210 }
 0x389   :  { %2023 = vtanh.f32 %v2289_v50  ;;  %v213_v53 = vmul.f32 %v2022_v51, %v211_v52 }
 0x38b   :  { %215 = vrot.lane.b32.xlu1 %v213_v53, %s2158_s21 }
 0x396   :  { %v2024_v54 = vpop.eup %2023 }
 0x397   :  { %297 = vrot.lane.b32.xlu0 %v2024_v54, %s2157_s2 }
 0x3fd   :  { %v216_v56 = vpop.permute.xlu1 %215 }
 0x3fe   :  { %v2294_v57 = vadd.f32 %v216_v56, %v208_v55 }
 0x400   :  { %2025 = vtanh.f32 %v2294_v57  ;;  %v361_v44 = vrot.slane %v2294_v57, 6 }
 0x409   :  { %v298_v58 = vpop.permute.xlu0 %297 }
 0x40a   :  { %v300_v59 = vmul.f32 %v2020_v48, %v298_v58 }
 0x40c   :  { %v420_v60 = vpack.c.bf16 %v300_v59, %v300_v59 }
 0x40d   :  { %v2026_v61 = vpop.eup %2025 }
 0x40e   :  { %221 = vrot.lane.b32.xlu1 %v2026_v61, %s2156_s13  ;;  %422 = vrot.lane.b32.xlu0 %v420_v60, %s2158_s21 }
 0x480   :  { %v222_v62 = vpop.permute.xlu1 %221  ;;  %v423_v7 = vpop.permute.xlu0 %422 }
 0x481   :  { %v224_v63 = vmul.f32 %v2022_v51, %v222_v62 }
 0x483   :  { %v301_v0 = vpack.c.bf16 %v224_v63, %v224_v63 }
 0x485   :  { %v303_v2 = vrot.slane %v301_v0, 1 }
 0x487   :  { %304 = vrot.lane.b32.xlu1 %v303_v2, %s2158_s21 }
 0x4f9   :  { %v305_v4 = vpop.permute.xlu1 %304 }
 0x4fa   :  { %1824 = vmatmul.mubr.msk.bf16.vlgmr.msra.gmra.mxu1 %vm148_vm2, %v305_v4  ;;  %1832 = vmatmul.mubr.msk.bf16.vlgmr.msra.gmra.mxu0 %vm148_vm2, %v305_v4 }
 0x4fb   :  { %1836 = vmatpush3.bf16.msra.mxu1 %v2303_v3  ;;  %1839 = vmatprep.mubr.msk.bf16.mxu1 %vm2155_vm0, %v2154_v1 }
 0x4fc   :  { %1837 = vmatprep.subr.bf16.mxu1 %v2154_v1  ;;  %1844 = vmatpush3.bf16.msra.mxu0 %v2238_v17 }
 0x4fd   :  { %1845 = vmatprep.subr.bf16.mxu0 %v2154_v1  ;;  %1847 = vmatprep.mubr.msk.bf16.mxu0 %vm2155_vm0, %v2154_v1 }
 0x4ff   :  { %1838 = vmatpush3.bf16.msra.mxu1 %v2311_v6 }
 0x500   :  { %1851 = vmatprep.subr.bf16.mxu1 %v2154_v1  ;;  %1846 = vmatpush3.bf16.msra.mxu0 %v2250_v19 }
 0x501   :  { %1859 = vmatprep.subr.bf16.mxu0 %v2154_v1 }
 0x502   :  { %1840 = vmatmul.mubr.msk.bf16.vlgmr.msra.gmra.mxu1 %vm148_vm2, %v423_v7 }
 0x503   :  { %1852 = vmatpush3.bf16.msra.mxu1 %v2243_v18  ;;  %1855 = vmatprep.mubr.msk.bf16.mxu1 %vm2155_vm0, %v2154_v1 }
 0x504   :  { %1853 = vmatprep.subr.bf16.mxu1 %v2154_v1 }
 0x507   :  { %1854 = vmatpush3.bf16.msra.mxu1 %v2255_v20 }
 0x508   :  { %1867 = vmatprep.subr.bf16.mxu1 %v2154_v1 }
 0x5ba   :  { %v343_v9 = vpop.f32.mrf.mxu1  ;;  %v414_v10 = vpop.f32.mrf.mxu0 }
 0x5bb   :  { %v350_v11 = vrot.slane %v343_v9, 4  ;;  %v415_v23 = vadd.f32 %v2283_v27, %v414_v10 }
 0x5bc   :  { %v1825_v12 = vpop.f32.mrf.mxu1  ;;  %v1833_v13 = vpop.f32.mrf.mxu0 }
 0x5bd   :  { %v352_v14 = vadd.f32 %v350_v11, %v2228_v5 }
 0x5be   :  { %v346_v15 = vpop.f32.mrf.mxu1  ;;  %v417_v16 = vpop.f32.mrf.mxu0 }
 0x5bf   :  { %2027 = vtanh.f32 %v352_v14  ;;  %v1688_v32 = vmul.f32 -1.442695, %v352_v14 }
 0x5c0   :  { %v1826_v21 = vpop.f32.mrf.mxu1  ;;  %v1834_v22 = vpop.f32.mrf.mxu0 }
 0x5c2   :  { %v473_v24 = vpop.f32.mrf.mxu1 }
 0x5c3   :  { %v479_v25 = vadd.f32 %v473_v24, %v415_v23 }
 0x5c4   :  { %v1841_v26 = vpop.f32.mrf.mxu1 }
 0x5c5   :  { %2029 = vtanh.f32 %v479_v25  ;;  %v1693_v33 = vmul.f32 -1.442695, %v479_v25 }
 0x5c6   :  { %v476_v28 = vpop.f32.mrf.mxu1  ;;  %2031 = vpow2.f32 %v1688_v32 }
 0x5c7   :  { %2033 = vpow2.f32 %v1693_v33 }
 0x5c8   :  { %v1842_v29 = vpop.f32.mrf.mxu1 }
 0x5cc   :  { %v2028_v30 = vpop.eup %2027 }
 0x5cd   :  { %365 = vrot.lane.b32.xlu1 %v2028_v30, %s2156_s13 }
 0x5d2   :  { %v2030_v31 = vpop.eup %2029 }
 0x5d3   :  { %493 = vrot.lane.b32.xlu0 %v2030_v31, %s2156_s13  ;;  %v2032_v34 = vpop.eup %2031 }
 0x5d4   :  { %v356_v35 = vadd.f32 1.0, %v2032_v34  ;;  %v2034_v36 = vpop.eup %2033 }
 0x5d5   :  { %v483_v37 = vadd.f32 1.0, %v2034_v36 }
 0x5d6   :  { %2035 = vrcp.f32 %v356_v35 }
 0x5d7   :  { %488 = vrot.lane.b32.xlu0 %v2289_v50, %s2158_s21  ;;  %2037 = vrcp.f32 %v483_v37 }
 0x5e3   :  { %v2036_v38 = vpop.eup %2035 }
 0x5e4   :  { %v2038_v41 = vpop.eup %2037  ;;  %v363_v45 = vmul.f32 %v2036_v38, %v361_v44 }
 0x63f   :  { %v366_v39 = vpop.permute.xlu1 %365 }
 0x640   :  { %v368_v40 = vmul.f32 %v2036_v38, %v366_v39 }
 0x642   :  { %370 = vrot.lane.b32.xlu1 %v368_v40, %s2158_s21 }
 0x645   :  { %v494_v42 = vpop.permute.xlu0 %493 }
 0x646   :  { %v496_v43 = vmul.f32 %v2038_v41, %v494_v42 }
 0x648   :  { %498 = vrot.lane.b32.xlu1 %v496_v43, %s2158_s21 }
 0x649   :  { %v489_v48 = vpop.permute.xlu0 %488 }
 0x64a   :  { %v491_v49 = vmul.f32 %v2038_v41, %v489_v48 }
 0x6b4   :  { %v371_v46 = vpop.permute.xlu1 %370 }
 0x6b5   :  { %v2340_v47 = vadd.f32 %v371_v46, %v363_v45 }
 0x6b7   :  { %2039 = vtanh.f32 %v2340_v47 }
 0x6ba   :  { %v499_v50 = vpop.permute.xlu1 %498 }
 0x6bb   :  { %v2343_v51 = vadd.f32 %v499_v50, %v491_v49 }
 0x6bd   :  { %2041 = vtanh.f32 %v2343_v51 }
 0x6c4   :  { %v2040_v52 = vpop.eup %2039 }
 0x6c5   :  { %376 = vrot.lane.b32.xlu0 %v2040_v52, %s2156_s13 }
 0x6ca   :  { %v2042_v53 = vpop.eup %2041 }
 0x6cb   :  { %504 = vrot.lane.b32.xlu1 %v2042_v53, %s2156_s13 }
 0x737   :  { %v377_v54 = vpop.permute.xlu0 %376 }
 0x738   :  { %v379_v55 = vmul.f32 %v2036_v38, %v377_v54  ;;  %v568_v38 = vrot.slane %v2340_v47, 6 }
 0x73a   :  { %v508_v56 = vpack.c.bf16 %v379_v55, %v379_v55 }
 0x73c   :  { %v510_v57 = vrot.slane %v508_v56, 2 }
 0x73d   :  { %v505_v58 = vpop.permute.xlu1 %504 }
 0x73e   :  { %v507_v59 = vmul.f32 %v2038_v41, %v505_v58  ;;  %511 = vrot.lane.b32.xlu0 %v510_v57, %s2158_s21 }
 0x740   :  { %v627_v60 = vpack.c.bf16 %v507_v59, %v507_v59 }
 0x742   :  { %629 = vrot.lane.b32.xlu1 %v627_v60, %s2158_s21 }
 0x7b0   :  { %v512_v61 = vpop.permute.xlu0 %511 }
 0x7b1   :  { %1848 = vmatmul.mubr.msk.bf16.vlgmr.msra.gmra.mxu0 %vm148_vm2, %v512_v61  ;;  %1856 = vmatmul.mubr.msk.bf16.vlgmr.msra.gmra.mxu1 %vm148_vm2, %v512_v61 }
 0x7b2   :  { %1860 = vmatpush3.bf16.msra.mxu0 %v2303_v3  ;;  %1863 = vmatprep.mubr.msk.bf16.mxu0 %vm2155_vm0, %v2154_v1 }
 0x7b3   :  { %1861 = vmatprep.subr.bf16.mxu0 %v2154_v1  ;;  %1868 = vmatpush3.bf16.msra.mxu1 %v2238_v17 }
 0x7b4   :  { %1869 = vmatprep.subr.bf16.mxu1 %v2154_v1  ;;  %1871 = vmatprep.mubr.msk.bf16.mxu1 %vm2155_vm0, %v2154_v1  ;;  %v630_v62 = vpop.permute.xlu1 %629 }
 0x7b6   :  { %1862 = vmatpush3.bf16.msra.mxu0 %v2311_v6 }
 0x7b7   :  { %1875 = vmatprep.subr.bf16.mxu0 %v2154_v1  ;;  %1870 = vmatpush3.bf16.msra.mxu1 %v2250_v19 }
 0x7b8   :  { %1883 = vmatprep.subr.bf16.mxu1 %v2154_v1 }
 0x7b9   :  { %1864 = vmatmul.mubr.msk.bf16.vlgmr.msra.gmra.mxu0 %vm148_vm2, %v630_v62 }
 0x7ba   :  { %1876 = vmatpush3.bf16.msra.mxu0 %v2243_v18  ;;  %1879 = vmatprep.mubr.msk.bf16.mxu0 %vm2155_vm0, %v2154_v1 }
 0x7bb   :  { %1877 = vmatprep.subr.bf16.mxu0 %v2154_v1 }
 0x7be   :  { %1878 = vmatpush3.bf16.msra.mxu0 %v2255_v20 }
 0x7bf   :  { %1891 = vmatprep.subr.bf16.mxu0 %v2154_v1 }
 0x871   :  { %v550_v63 = vpop.f32.mrf.mxu0  ;;  %v621_v0 = vpop.f32.mrf.mxu1 }
 0x872   :  { %v557_v2 = vrot.slane %v550_v63, 2  ;;  %v622_v14 = vadd.f32 %v2283_v27, %v621_v0 }
 0x873   :  { %v1849_v4 = vpop.f32.mrf.mxu0  ;;  %v1857_v7 = vpop.f32.mrf.mxu1 }
 0x874   :  { %v559_v9 = vadd.f32 %v557_v2, %v2228_v5 }
 0x875   :  { %v553_v10 = vpop.f32.mrf.mxu0  ;;  %v624_v11 = vpop.f32.mrf.mxu1 }
 0x876   :  { %2043 = vtanh.f32 %v559_v9  ;;  %v1695_v5 = vmul.f32 -1.442695, %v559_v9 }
 0x877   :  { %v1850_v12 = vpop.f32.mrf.mxu0  ;;  %v1858_v13 = vpop.f32.mrf.mxu1 }
 0x879   :  { %v668_v15 = vpop.f32.mrf.mxu0 }
 0x87a   :  { %v674_v16 = vadd.f32 %v668_v15, %v622_v14 }
 0x87b   :  { %v1865_v21 = vpop.f32.mrf.mxu0 }
 0x87c   :  { %2045 = vtanh.f32 %v674_v16  ;;  %v1698_v26 = vmul.f32 -1.442695, %v674_v16 }
 0x87d   :  { %v671_v22 = vpop.f32.mrf.mxu0  ;;  %2047 = vpow2.f32 %v1695_v5 }
 0x87e   :  { %2049 = vpow2.f32 %v1698_v26 }
 0x87f   :  { %v1866_v23 = vpop.f32.mrf.mxu0 }
 0x883   :  { %v2044_v24 = vpop.eup %2043 }
 0x884   :  { %572 = vrot.lane.b32.xlu0 %v2044_v24, %s2156_s13 }
 0x889   :  { %v2046_v25 = vpop.eup %2045 }
 0x88a   :  { %684 = vrot.lane.b32.xlu1 %v2046_v25, %s2156_s13  ;;  %v2048_v28 = vpop.eup %2047 }
 0x88b   :  { %v563_v29 = vadd.f32 1.0, %v2048_v28  ;;  %v2050_v30 = vpop.eup %2049 }
 0x88c   :  { %v678_v31 = vadd.f32 1.0, %v2050_v30 }
 0x88d   :  { %2051 = vrcp.f32 %v563_v29 }
 0x88e   :  { %2053 = vrcp.f32 %v678_v31 }
 0x89a   :  { %v2052_v32 = vpop.eup %2051 }
 0x89b   :  { %v2054_v35 = vpop.eup %2053  ;;  %v570_v39 = vmul.f32 %v2052_v32, %v568_v38 }
 0x89c   :  { %v682_v42 = vmul.f32 %v2054_v35, %v2343_v51 }
 0x8f6   :  { %v573_v33 = vpop.permute.xlu0 %572 }
 0x8f7   :  { %v575_v34 = vmul.f32 %v2052_v32, %v573_v33 }
 0x8f9   :  { %577 = vrot.lane.b32.xlu0 %v575_v34, %s2158_s21 }
 0x8fc   :  { %v685_v36 = vpop.permute.xlu1 %684 }
 0x8fd   :  { %v687_v37 = vmul.f32 %v2054_v35, %v685_v36 }
 0x8ff   :  { %689 = vrot.lane.b32.xlu1 %v687_v37, %s2158_s21 }
 0x96b   :  { %v578_v40 = vpop.permute.xlu0 %577 }
 0x96c   :  { %v2378_v41 = vadd.f32 %v578_v40, %v570_v39 }
 0x96e   :  { %2055 = vtanh.f32 %v2378_v41  ;;  %v756_v30 = vrot.slane %v2378_v41, 6 }
 0x971   :  { %v690_v43 = vpop.permute.xlu1 %689 }
 0x972   :  { %v2382_v44 = vadd.f32 %v690_v43, %v682_v42 }
 0x974   :  { %2057 = vtanh.f32 %v2382_v44 }
 0x97b   :  { %v2056_v45 = vpop.eup %2055 }
 0x97c   :  { %583 = vrot.lane.b32.xlu0 %v2056_v45, %s2156_s13 }
 0x981   :  { %v2058_v46 = vpop.eup %2057 }
 0x982   :  { %695 = vrot.lane.b32.xlu1 %v2058_v46, %s2156_s13 }
 0x9ee   :  { %v584_v47 = vpop.permute.xlu0 %583 }
 0x9ef   :  { %v586_v48 = vmul.f32 %v2052_v32, %v584_v47 }
 0x9f1   :  { %v699_v49 = vpack.c.bf16 %v586_v48, %v586_v48 }
 0x9f3   :  { %v701_v50 = vrot.slane %v699_v49, 3 }
 0x9f4   :  { %v696_v52 = vpop.permute.xlu1 %695 }
 0x9f5   :  { %v698_v53 = vmul.f32 %v2054_v35, %v696_v52  ;;  %702 = vrot.lane.b32.xlu0 %v701_v50, %s2158_s21 }
 0x9f7   :  { %v815_v51 = vpack.c.bf16 %v698_v53, %v698_v53 }
 0x9f9   :  { %817 = vrot.lane.b32.xlu1 %v815_v51, %s2158_s21 }
 0xa67   :  { %v703_v54 = vpop.permute.xlu0 %702 }
 0xa68   :  { %1872 = vmatmul.mubr.msk.bf16.vlgmr.msra.gmra.mxu1 %vm148_vm2, %v703_v54  ;;  %1880 = vmatmul.mubr.msk.bf16.vlgmr.msra.gmra.mxu0 %vm148_vm2, %v703_v54 }
 0xa69   :  { %1884 = vmatpush3.bf16.msra.mxu1 %v2303_v3  ;;  %1887 = vmatprep.mubr.msk.bf16.mxu1 %vm2155_vm0, %v2154_v1 }
 0xa6a   :  { %1885 = vmatprep.subr.bf16.mxu1 %v2154_v1  ;;  %1892 = vmatpush3.bf16.msra.mxu0 %v2238_v17 }
 0xa6b   :  { %1893 = vmatprep.subr.bf16.mxu0 %v2154_v1  ;;  %1895 = vmatprep.mubr.msk.bf16.mxu0 %vm2155_vm0, %v2154_v1  ;;  %v818_v55 = vpop.permute.xlu1 %817 }
 0xa6d   :  { %1886 = vmatpush3.bf16.msra.mxu1 %v2311_v6 }
 0xa6e   :  { %1899 = vmatprep.subr.bf16.mxu1 %v2154_v1  ;;  %1894 = vmatpush3.bf16.msra.mxu0 %v2250_v19 }
 0xa6f   :  { %1907 = vmatprep.subr.bf16.mxu0 %v2154_v1 }
 0xa70   :  { %1888 = vmatmul.mubr.msk.bf16.vlgmr.msra.gmra.mxu1 %vm148_vm2, %v818_v55 }
 0xa71   :  { %1900 = vmatpush3.bf16.msra.mxu1 %v2243_v18  ;;  %1903 = vmatprep.mubr.msk.bf16.mxu1 %vm2155_vm0, %v2154_v1 }
 0xa72   :  { %1901 = vmatprep.subr.bf16.mxu1 %v2154_v1 }
 0xa75   :  { %1902 = vmatpush3.bf16.msra.mxu1 %v2255_v20 }
 0xa76   :  { %1915 = vmatprep.subr.bf16.mxu1 %v2154_v1 }
 0xb28   :  { %v741_v56 = vpop.f32.mrf.mxu1  ;;  %v809_v57 = vpop.f32.mrf.mxu0 }
 0xb29   :  { %v747_v58 = vadd.f32 %v741_v56, %v2231_v8  ;;  %v810_v2 = vadd.f32 %v2283_v27, %v809_v57 }
 0xb2a   :  { %v1873_v59 = vpop.f32.mrf.mxu1  ;;  %v1881_v60 = vpop.f32.mrf.mxu0 }
 0xb2b   :  { %2059 = vtanh.f32 %v747_v58  ;;  %v1700_v14 = vmul.f32 -1.442695, %v747_v58 }
 0xb2c   :  { %v744_v61 = vpop.f32.mrf.mxu1  ;;  %v812_v62 = vpop.f32.mrf.mxu0 }
 0xb2e   :  { %v1874_v63 = vpop.f32.mrf.mxu1  ;;  %v1882_v0 = vpop.f32.mrf.mxu0 }
 0xb30   :  { %v856_v4 = vpop.f32.mrf.mxu1 }
 0xb31   :  { %v862_v7 = vadd.f32 %v856_v4, %v810_v2 }
 0xb32   :  { %v1889_v9 = vpop.f32.mrf.mxu1 }
 0xb33   :  { %2061 = vtanh.f32 %v862_v7  ;;  %v1703_v15 = vmul.f32 -1.442695, %v862_v7 }
 0xb34   :  { %v859_v10 = vpop.f32.mrf.mxu1  ;;  %2063 = vpow2.f32 %v1700_v14 }
 0xb35   :  { %2065 = vpow2.f32 %v1703_v15 }
 0xb36   :  { %v1890_v11 = vpop.f32.mrf.mxu1 }
 0xb38   :  { %v2060_v12 = vpop.eup %2059 }
 0xb39   :  { %760 = vrot.lane.b32.xlu0 %v2060_v12, %s2156_s13 }
 0xb40   :  { %v2062_v13 = vpop.eup %2061 }
 0xb41   :  { %872 = vrot.lane.b32.xlu1 %v2062_v13, %s2156_s13  ;;  %v2064_v16 = vpop.eup %2063 }
 0xb42   :  { %v751_v21 = vadd.f32 1.0, %v2064_v16  ;;  %v2066_v22 = vpop.eup %2065 }
 0xb43   :  { %v866_v23 = vadd.f32 1.0, %v2066_v22 }
 0xb44   :  { %2067 = vrcp.f32 %v751_v21 }
 0xb45   :  { %2069 = vrcp.f32 %v866_v23 }
 0xb51   :  { %v2068_v24 = vpop.eup %2067 }
 0xb52   :  { %v2070_v26 = vpop.eup %2069  ;;  %v758_v31 = vmul.f32 %v2068_v24, %v756_v30 }
 0xb53   :  { %v870_v34 = vmul.f32 %v2070_v26, %v2382_v44 }
 0xbab   :  { %v761_v25 = vpop.permute.xlu0 %760 }
 0xbac   :  { %v763_v5 = vmul.f32 %v2068_v24, %v761_v25 }
 0xbae   :  { %765 = vrot.lane.b32.xlu0 %v763_v5, %s2158_s21 }
 0xbb3   :  { %v873_v28 = vpop.permute.xlu1 %872 }
 0xbb4   :  { %v875_v29 = vmul.f32 %v2070_v26, %v873_v28 }
 0xbb6   :  { %877 = vrot.lane.b32.xlu1 %v875_v29, %s2158_s21 }
 0xc20   :  { %v766_v32 = vpop.permute.xlu0 %765 }
 0xc21   :  { %v2417_v33 = vadd.f32 %v766_v32, %v758_v31 }
 0xc23   :  { %2071 = vtanh.f32 %v2417_v33  ;;  %v946_v22 = vrot.slane %v2417_v33, 6 }
 0xc28   :  { %v878_v35 = vpop.permute.xlu1 %877 }
 0xc29   :  { %v2421_v36 = vadd.f32 %v878_v35, %v870_v34 }
 0xc2b   :  { %2073 = vtanh.f32 %v2421_v36 }
 0xc30   :  { %v2072_v37 = vpop.eup %2071 }
 0xc31   :  { %771 = vrot.lane.b32.xlu0 %v2072_v37, %s2156_s13 }
 0xc38   :  { %v2074_v38 = vpop.eup %2073 }
 0xc39   :  { %883 = vrot.lane.b32.xlu1 %v2074_v38, %s2156_s13 }
 0xca3   :  { %v772_v39 = vpop.permute.xlu0 %771 }
 0xca4   :  { %v774_v40 = vmul.f32 %v2068_v24, %v772_v39 }
 0xca6   :  { %v887_v41 = vpack.c.bf16 %v774_v40, %v774_v40 }
 0xca8   :  { %889 = vrot.lane.b32.xlu0 %v887_v41, %s2158_s21 }
 0xcab   :  { %v884_v42 = vpop.permute.xlu1 %883 }
 0xcac   :  { %v886_v43 = vmul.f32 %v2070_v26, %v884_v42 }
 0xcae   :  { %v1005_v45 = vpack.c.bf16 %v886_v43, %v886_v43 }
 0xcb0   :  { %1007 = vrot.lane.b32.xlu1 %v1005_v45, %s2158_s21 }
 0xd1a   :  { %v890_v44 = vpop.permute.xlu0 %889 }
 0xd1b   :  { %1896 = vmatmul.mubr.msk.bf16.vlgmr.msra.gmra.mxu0 %vm148_vm2, %v890_v44  ;;  %1904 = vmatmul.mubr.msk.bf16.vlgmr.msra.gmra.mxu1 %vm148_vm2, %v890_v44 }
 0xd1c   :  { %1908 = vmatpush3.bf16.msra.mxu0 %v2303_v3  ;;  %1911 = vmatprep.mubr.msk.bf16.mxu0 %vm2155_vm0, %v2154_v1 }
 0xd1d   :  { %1909 = vmatprep.subr.bf16.mxu0 %v2154_v1  ;;  %1916 = vmatpush3.bf16.msra.mxu1 %v2238_v17 }
 0xd1e   :  { %1917 = vmatprep.subr.bf16.mxu1 %v2154_v1  ;;  %1919 = vmatprep.mubr.msk.bf16.mxu1 %vm2155_vm0, %v2154_v1 }
 0xd20   :  { %1910 = vmatpush3.bf16.msra.mxu0 %v2311_v6 }
 0xd21   :  { %1923 = vmatprep.subr.bf16.mxu0 %v2154_v1  ;;  %1918 = vmatpush3.bf16.msra.mxu1 %v2250_v19 }
 0xd22   :  { %v1008_v46 = vpop.permute.xlu1 %1007  ;;  %1931 = vmatprep.subr.bf16.mxu1 %v2154_v1 }
 0xd23   :  { %1912 = vmatmul.mubr.msk.bf16.vlgmr.msra.gmra.mxu0 %vm148_vm2, %v1008_v46 }
 0xd24   :  { %1924 = vmatpush3.bf16.msra.mxu0 %v2243_v18  ;;  %1927 = vmatprep.mubr.msk.bf16.mxu0 %vm2155_vm0, %v2154_v1 }
 0xd25   :  { %1925 = vmatprep.subr.bf16.mxu0 %v2154_v1 }
 0xd28   :  { %1926 = vmatpush3.bf16.msra.mxu0 %v2255_v20 }
 0xd29   :  { %1939 = vmatprep.subr.bf16.mxu0 %v2154_v1 }
 0xddb   :  { %v928_v47 = vpop.f32.mrf.mxu0  ;;  %v999_v48 = vpop.f32.mrf.mxu1 }
 0xddc   :  { %v935_v49 = vrot.slane %v928_v47, 6  ;;  %v1000_v57 = vadd.f32 %v2283_v27, %v999_v48 }
 0xddd   :  { %v1897_v50 = vpop.f32.mrf.mxu0  ;;  %v1905_v52 = vpop.f32.mrf.mxu1 }
 0xdde   :  { %v937_v53 = vadd.f32 %v935_v49, %v2231_v8 }
 0xddf   :  { %v931_v51 = vpop.f32.mrf.mxu0  ;;  %v1002_v54 = vpop.f32.mrf.mxu1 }
 0xde0   :  { %2075 = vtanh.f32 %v937_v53  ;;  %v1705_v2 = vmul.f32 -1.442695, %v937_v53 }
 0xde1   :  { %v1898_v55 = vpop.f32.mrf.mxu0  ;;  %v1906_v56 = vpop.f32.mrf.mxu1 }
 0xde3   :  { %v1046_v58 = vpop.f32.mrf.mxu0 }
 0xde4   :  { %v1052_v59 = vadd.f32 %v1046_v58, %v1000_v57 }
 0xde5   :  { %v1913_v60 = vpop.f32.mrf.mxu0 }
 0xde6   :  { %2077 = vtanh.f32 %v1052_v59  ;;  %v1708_v4 = vmul.f32 -1.442695, %v1052_v59 }
 0xde7   :  { %v1049_v61 = vpop.f32.mrf.mxu0  ;;  %2079 = vpow2.f32 %v1705_v2 }
 0xde8   :  { %2081 = vpow2.f32 %v1708_v4 }
 0xde9   :  { %v1914_v62 = vpop.f32.mrf.mxu0 }
 0xded   :  { %v2076_v63 = vpop.eup %2075 }
 0xdee   :  { %950 = vrot.lane.b32.xlu0 %v2076_v63, %s2156_s13 }
 0xdf3   :  { %v2078_v0 = vpop.eup %2077 }
 0xdf4   :  { %1062 = vrot.lane.b32.xlu1 %v2078_v0, %s2156_s13  ;;  %v2080_v7 = vpop.eup %2079 }
 0xdf5   :  { %v941_v9 = vadd.f32 1.0, %v2080_v7  ;;  %v2082_v10 = vpop.eup %2081 }
 0xdf6   :  { %v1056_v11 = vadd.f32 1.0, %v2082_v10 }
 0xdf7   :  { %2083 = vrcp.f32 %v941_v9 }
 0xdf8   :  { %2085 = vrcp.f32 %v1056_v11 }
 0xe04   :  { %v2084_v12 = vpop.eup %2083 }
 0xe05   :  { %v2086_v15 = vpop.eup %2085  ;;  %v948_v23 = vmul.f32 %v2084_v12, %v946_v22 }
 0xe06   :  { %v1060_v5 = vmul.f32 %v2086_v15, %v2421_v36 }
 0xe60   :  { %v951_v13 = vpop.permute.xlu0 %950 }
 0xe61   :  { %v953_v14 = vmul.f32 %v2084_v12, %v951_v13 }
 0xe63   :  { %955 = vrot.lane.b32.xlu0 %v953_v14, %s2158_s21 }
 0xe66   :  { %v1063_v16 = vpop.permute.xlu1 %1062 }
 0xe67   :  { %v1065_v21 = vmul.f32 %v2086_v15, %v1063_v16 }
 0xe69   :  { %1067 = vrot.lane.b32.xlu1 %v1065_v21, %s2158_s21 }
 0xed5   :  { %v956_v24 = vpop.permute.xlu0 %955 }
 0xed6   :  { %v2456_v25 = vadd.f32 %v956_v24, %v948_v23 }
 0xed8   :  { %2087 = vtanh.f32 %v2456_v25  ;;  %v1137_v9 = vrot.slane %v2456_v25, 6 }
 0xedb   :  { %v1068_v26 = vpop.permute.xlu1 %1067 }
 0xedc   :  { %v2460_v28 = vadd.f32 %v1068_v26, %v1060_v5 }
 0xede   :  { %2089 = vtanh.f32 %v2460_v28 }
 0xee5   :  { %v2088_v29 = vpop.eup %2087 }
 0xee6   :  { %961 = vrot.lane.b32.xlu0 %v2088_v29, %s2156_s13 }
 0xeeb   :  { %v2090_v30 = vpop.eup %2089 }
 0xeec   :  { %1073 = vrot.lane.b32.xlu1 %v2090_v30, %s2156_s13 }
 0xf58   :  { %v962_v31 = vpop.permute.xlu0 %961 }
 0xf59   :  { %v964_v32 = vmul.f32 %v2084_v12, %v962_v31 }
 0xf5b   :  { %v1077_v33 = vpack.c.bf16 %v964_v32, %v964_v32 }
 0xf5d   :  { %v1079_v34 = vrot.slane %v1077_v33, 1 }
 0xf5e   :  { %v1074_v35 = vpop.permute.xlu1 %1073 }
 0xf5f   :  { %v1076_v37 = vmul.f32 %v2086_v15, %v1074_v35  ;;  %1080 = vrot.lane.b32.xlu0 %v1079_v34, %s2158_s21 }
 0xf61   :  { %v1196_v36 = vpack.c.bf16 %v1076_v37, %v1076_v37 }
 0xf63   :  { %1198 = vrot.lane.b32.xlu1 %v1196_v36, %s2158_s21 }
 0xfd1   :  { %v1081_v38 = vpop.permute.xlu0 %1080 }
 0xfd2   :  { %1920 = vmatmul.mubr.msk.bf16.vlgmr.msra.gmra.mxu1 %vm148_vm2, %v1081_v38  ;;  %1928 = vmatmul.mubr.msk.bf16.vlgmr.msra.gmra.mxu0 %vm148_vm2, %v1081_v38 }
 0xfd3   :  { %1932 = vmatpush3.bf16.msra.mxu1 %v2303_v3  ;;  %1935 = vmatprep.mubr.msk.bf16.mxu1 %vm2155_vm0, %v2154_v1 }
 0xfd4   :  { %1933 = vmatprep.subr.bf16.mxu1 %v2154_v1  ;;  %1940 = vmatpush3.bf16.msra.mxu0 %v2238_v17 }
 0xfd5   :  { %1941 = vmatprep.subr.bf16.mxu0 %v2154_v1  ;;  %1943 = vmatprep.mubr.msk.bf16.mxu0 %vm2155_vm0, %v2154_v1  ;;  %v1199_v39 = vpop.permute.xlu1 %1198 }
 0xfd7   :  { %1934 = vmatpush3.bf16.msra.mxu1 %v2311_v6 }
 0xfd8   :  { %1947 = vmatprep.subr.bf16.mxu1 %v2154_v1  ;;  %1942 = vmatpush3.bf16.msra.mxu0 %v2250_v19 }
 0xfd9   :  { %1955 = vmatprep.subr.bf16.mxu0 %v2154_v1 }
 0xfda   :  { %1936 = vmatmul.mubr.msk.bf16.vlgmr.msra.gmra.mxu1 %vm148_vm2, %v1199_v39 }
 0xfdb   :  { %1948 = vmatpush3.bf16.msra.mxu1 %v2243_v18  ;;  %1951 = vmatprep.mubr.msk.bf16.mxu1 %vm2155_vm0, %v2154_v1 }
 0xfdc   :  { %1949 = vmatprep.subr.bf16.mxu1 %v2154_v1 }
 0xfdf   :  { %1950 = vmatpush3.bf16.msra.mxu1 %v2255_v20 }
 0xfe0   :  { %1963 = vmatprep.subr.bf16.mxu1 %v2154_v1 }
0x1092   :  { %v1119_v17 = vpop.f32.mrf.mxu1  ;;  %v1190_v40 = vpop.f32.mrf.mxu0 }
0x1093   :  { %v1126_v41 = vrot.slane %v1119_v17, 4  ;;  %v1191_v48 = vadd.f32 %v2283_v27, %v1190_v40 }
0x1094   :  { %v1921_v19 = vpop.f32.mrf.mxu1  ;;  %v1929_v42 = vpop.f32.mrf.mxu0 }
0x1095   :  { %v1128_v43 = vadd.f32 %v1126_v41, %v2231_v8 }
0x1096   :  { %v1122_v45 = vpop.f32.mrf.mxu1  ;;  %v1193_v44 = vpop.f32.mrf.mxu0 }
0x1097   :  { %2091 = vtanh.f32 %v1128_v43  ;;  %v1710_v56 = vmul.f32 -1.442695, %v1128_v43 }
0x1098   :  { %v1922_v46 = vpop.f32.mrf.mxu1  ;;  %v1930_v47 = vpop.f32.mrf.mxu0 }
0x109a   :  { %v1237_v49 = vpop.f32.mrf.mxu1 }
0x109b   :  { %v1243_v50 = vadd.f32 %v1237_v49, %v1191_v48 }
0x109c   :  { %v1937_v52 = vpop.f32.mrf.mxu1 }
0x109d   :  { %2093 = vtanh.f32 %v1243_v50  ;;  %v1713_v57 = vmul.f32 -1.442695, %v1243_v50 }
0x109e   :  { %v1240_v53 = vpop.f32.mrf.mxu1  ;;  %2095 = vpow2.f32 %v1710_v56 }
0x109f   :  { %2097 = vpow2.f32 %v1713_v57 }
0x10a0   :  { %v1938_v51 = vpop.f32.mrf.mxu1 }
0x10a4   :  { %v2092_v54 = vpop.eup %2091 }
0x10a5   :  { %1141 = vrot.lane.b32.xlu0 %v2092_v54, %s2156_s13 }
0x10aa   :  { %v2094_v55 = vpop.eup %2093 }
0x10ab   :  { %1253 = vrot.lane.b32.xlu1 %v2094_v55, %s2156_s13  ;;  %v2096_v58 = vpop.eup %2095 }
0x10ac   :  { %v1132_v59 = vadd.f32 1.0, %v2096_v58  ;;  %v2098_v60 = vpop.eup %2097 }
0x10ad   :  { %v1247_v61 = vadd.f32 1.0, %v2098_v60 }
0x10ae   :  { %2099 = vrcp.f32 %v1132_v59 }
0x10af   :  { %2101 = vrcp.f32 %v1247_v61 }
0x10bb   :  { %v2100_v62 = vpop.eup %2099 }
0x10bc   :  { %v2102_v2 = vpop.eup %2101  ;;  %v1139_v10 = vmul.f32 %v2100_v62, %v1137_v9 }
0x10bd   :  { %v1251_v13 = vmul.f32 %v2102_v2, %v2460_v28 }
0x1117   :  { %v1142_v63 = vpop.permute.xlu0 %1141 }
0x1118   :  { %v1144_v0 = vmul.f32 %v2100_v62, %v1142_v63 }
0x111a   :  { %1146 = vrot.lane.b32.xlu0 %v1144_v0, %s2158_s21 }
0x111d   :  { %v1254_v4 = vpop.permute.xlu1 %1253 }
0x111e   :  { %v1256_v7 = vmul.f32 %v2102_v2, %v1254_v4 }
0x1120   :  { %1258 = vrot.lane.b32.xlu1 %v1256_v7, %s2158_s21 }
0x118c   :  { %v1147_v11 = vpop.permute.xlu0 %1146 }
0x118d   :  { %v2495_v12 = vadd.f32 %v1147_v11, %v1139_v10 }
0x118f   :  { %2103 = vtanh.f32 %v2495_v12  ;;  %v1328_v51 = vrot.slane %v2495_v12, 6 }
0x1192   :  { %v1259_v14 = vpop.permute.xlu1 %1258 }
0x1193   :  { %v2499_v15 = vadd.f32 %v1259_v14, %v1251_v13  ;;  %v2131_v14 = vld [vmem:[%s2569_s6] ss:$0 sm:$0xff] }
0x1195   :  { %2105 = vtanh.f32 %v2499_v15 }
0x119c   :  { %v2104_v16 = vpop.eup %2103 }
0x119d   :  { %1152 = vrot.lane.b32.xlu0 %v2104_v16, %s2156_s13 }
0x11a2   :  { %v2106_v21 = vpop.eup %2105 }
0x11a3   :  { %1264 = vrot.lane.b32.xlu1 %v2106_v21, %s2156_s13 }
0x120f   :  { %v1153_v22 = vpop.permute.xlu0 %1152 }
0x1210   :  { %v1155_v23 = vmul.f32 %v2100_v62, %v1153_v22 }
0x1212   :  { %v1268_v24 = vpack.c.bf16 %v1155_v23, %v1155_v23 }
0x1214   :  { %v1270_v25 = vrot.slane %v1268_v24, 2 }
0x1215   :  { %v1265_v5 = vpop.permute.xlu1 %1264 }
0x1216   :  { %v1267_v26 = vmul.f32 %v2102_v2, %v1265_v5  ;;  %1271 = vrot.lane.b32.xlu0 %v1270_v25, %s2158_s21 }
0x1218   :  { %v1387_v28 = vpack.c.bf16 %v1267_v26, %v1267_v26 }
0x121a   :  { %1389 = vrot.lane.b32.xlu1 %v1387_v28, %s2158_s21 }
0x1288   :  { %v1272_v29 = vpop.permute.xlu0 %1271 }
0x1289   :  { %1944 = vmatmul.mubr.msk.bf16.vlgmr.msra.gmra.mxu0 %vm148_vm2, %v1272_v29  ;;  %1952 = vmatmul.mubr.msk.bf16.vlgmr.msra.gmra.mxu1 %vm148_vm2, %v1272_v29 }
0x128a   :  { %1956 = vmatpush3.bf16.msra.mxu0 %v2303_v3  ;;  %1959 = vmatprep.mubr.msk.bf16.mxu0 %vm2155_vm0, %v2154_v1 }
0x128b   :  { %1957 = vmatprep.subr.bf16.mxu0 %v2154_v1  ;;  %1964 = vmatpush3.bf16.msra.mxu1 %v2243_v18 }
0x128c   :  { %1965 = vmatprep.subr.bf16.mxu1 %v2154_v1  ;;  %1967 = vmatprep.mubr.msk.bf16.mxu1 %vm2155_vm0, %v2154_v1  ;;  %v1390_v30 = vpop.permute.xlu1 %1389 }
0x128e   :  { %1958 = vmatpush3.bf16.msra.mxu0 %v2311_v6 }
0x128f   :  { %1971 = vmatprep.subr.bf16.mxu0 %v2154_v1  ;;  %1966 = vmatpush3.bf16.msra.mxu1 %v2255_v20 }
0x1290   :  { %1979 = vmatprep.subr.bf16.mxu1 %v2154_v1 }
0x1291   :  { %1960 = vmatmul.mubr.msk.bf16.vlgmr.msra.gmra.mxu0 %vm148_vm2, %v1390_v30 }
0x1292   :  { %1972 = vmatpush3.bf16.msra.mxu0 %v2303_v3  ;;  %1975 = vmatprep.mubr.msk.bf16.mxu0 %vm2155_vm0, %v2154_v1 }
0x1293   :  { %1973 = vmatprep.subr.bf16.mxu0 %v2154_v1 }
0x1296   :  { %1974 = vmatpush3.bf16.msra.mxu0 %v2311_v6 }
0x1349   :  { %v1310_v18 = vpop.f32.mrf.mxu0  ;;  %v1381_v31 = vpop.f32.mrf.mxu1 }
0x134a   :  { %v1317_v32 = vrot.slane %v1310_v18, 2  ;;  %v1382_v3 = vadd.f32 %v2283_v27, %v1381_v31 }
0x134b   :  { %v1945_v33 = vpop.f32.mrf.mxu0  ;;  %v1953_v34 = vpop.f32.mrf.mxu1 }
0x134c   :  { %v1319_v20 = vadd.f32 %v1317_v32, %v2231_v8 }
0x134d   :  { %v1313_v35 = vpop.f32.mrf.mxu0  ;;  %v1384_v37 = vpop.f32.mrf.mxu1 }
0x134e   :  { %2107 = vtanh.f32 %v1319_v20  ;;  %v1715_v8 = vmul.f32 -1.442695, %v1319_v20  ;;  %v2001_v35 = vld [vmem:[%s2570_s7 + $0x8] sm:$0xff]   ;;  %v2002_v37 = vld [vmem:[%s2570_s7] sm:$0xff]  }
0x134f   :  { %v1946_v36 = vpop.f32.mrf.mxu0  ;;  %v1954_v38 = vpop.f32.mrf.mxu1 }
0x1351   :  { %v1428_v39 = vpop.f32.mrf.mxu0 }
0x1352   :  { %v1434_v17 = vadd.f32 %v1428_v39, %v1382_v3 }
0x1353   :  { %v1961_v40 = vpop.f32.mrf.mxu0 }
0x1354   :  { %2109 = vtanh.f32 %v1434_v17  ;;  %v1718_v43 = vmul.f32 -1.442695, %v1434_v17 }
0x1355   :  { %v1431_v41 = vpop.f32.mrf.mxu0  ;;  %2111 = vpow2.f32 %v1715_v8 }
0x1356   :  { %2113 = vpow2.f32 %v1718_v43 }
0x1357   :  { %v1962_v6 = vpop.f32.mrf.mxu0 }
0x135b   :  { %v2108_v19 = vpop.eup %2107 }
0x135c   :  { %1332 = vrot.lane.b32.xlu0 %v2108_v19, %s2156_s13 }
0x1361   :  { %v2110_v42 = vpop.eup %2109 }
0x1362   :  { %1444 = vrot.lane.b32.xlu1 %v2110_v42, %s2156_s13  ;;  %v2112_v45 = vpop.eup %2111 }
0x1363   :  { %v1323_v44 = vadd.f32 1.0, %v2112_v45  ;;  %v2114_v46 = vpop.eup %2113 }
0x1364   :  { %v1438_v27 = vadd.f32 1.0, %v2114_v46 }
0x1365   :  { %2115 = vrcp.f32 %v1323_v44 }
0x1366   :  { %2117 = vrcp.f32 %v1438_v27 }
0x1372   :  { %v2116_v47 = vpop.eup %2115 }
0x1373   :  { %v2118_v50 = vpop.eup %2117  ;;  %v1330_v54 = vmul.f32 %v2116_v47, %v1328_v51 }
0x1374   :  { %v1442_v57 = vmul.f32 %v2118_v50, %v2499_v15 }
0x13ce   :  { %v1333_v48 = vpop.permute.xlu0 %1332 }
0x13cf   :  { %v1335_v49 = vmul.f32 %v2116_v47, %v1333_v48 }
0x13d1   :  { %1337 = vrot.lane.b32.xlu0 %v1335_v49, %s2158_s21 }
0x13d4   :  { %v1445_v52 = vpop.permute.xlu1 %1444 }
0x13d5   :  { %v1447_v53 = vmul.f32 %v2118_v50, %v1445_v52 }
0x13d7   :  { %1449 = vrot.lane.b32.xlu1 %v1447_v53, %s2158_s21 }
0x1443   :  { %v1338_v55 = vpop.permute.xlu0 %1337 }
0x1444   :  { %v1340_v56 = vadd.f32 %v1338_v55, %v1330_v54 }
0x1446   :  { %2119 = vtanh.f32 %v1340_v56 }
0x1449   :  { %v1450_v58 = vpop.permute.xlu1 %1449 }
0x144a   :  { %v1452_v59 = vadd.f32 %v1450_v58, %v1442_v57 }
0x144c   :  { %2121 = vtanh.f32 %v1452_v59 }
0x1453   :  { %v2120_v60 = vpop.eup %2119 }
0x1454   :  { %1343 = vrot.lane.b32.xlu0 %v2120_v60, %s2156_s13 }
0x1459   :  { %v2122_v61 = vpop.eup %2121 }
0x145a   :  { %1455 = vrot.lane.b32.xlu1 %v2122_v61, %s2156_s13 }
0x14c6   :  { %v1344_v62 = vpop.permute.xlu0 %1343 }
0x14c7   :  { %v1346_v63 = vmul.f32 %v2116_v47, %v1344_v62 }
0x14c9   :  { %v1459_v0 = vpack.c.bf16 %v1346_v63, %v1346_v63  ;;  %v1580_v39 = vrot.slane %v1346_v63, 6 }
0x14cb   :  { %v1461_v2 = vrot.slane %v1459_v0, 3 }
0x14cc   :  { %v1456_v4 = vpop.permute.xlu1 %1455 }
0x14cd   :  { %v1458_v7 = vmul.f32 %v2118_v50, %v1456_v4  ;;  %1462 = vrot.lane.b32.xlu0 %v1461_v2, %s2158_s21 }
0x14cf   :  { %v1507_v9 = vpack.c.bf16 %v1458_v7, %v1458_v7 }
0x14d1   :  { %1509 = vrot.lane.b32.xlu1 %v1507_v9, %s2158_s21 }
0x153f   :  { %v1463_v10 = vpop.permute.xlu0 %1462 }
0x1540   :  { %1968 = vmatmul.mubr.msk.bf16.vlgmr.msra.gmra.mxu1 %vm148_vm2, %v1463_v10 }
0x1541   :  { %1983 = vmatprep.mubr.msk.bf16.mxu1 %vm2155_vm0, %v2154_v1  ;;  %1980 = vmatpush3.bf16.msra.mxu1 %v2001_v35 }
0x1542   :  { %1981 = vmatprep.subr.bf16.mxu1 %v2154_v1  ;;  %v1722_v1 = vld [vmem:[%s2571_s8] ss:$0 sm:$0xff] }
0x1543   :  { %v1510_v11 = vpop.permute.xlu1 %1509 }
0x1544   :  { %1976 = vmatmul.mubr.msk.bf16.vlgmr.msra.gmra.mxu0 %vm148_vm2, %v1510_v11 }
0x1545   :  { %1982 = vmatpush3.bf16.msra.mxu1 %v2002_v37 }
0x1600   :  { %v1501_v12 = vpop.f32.mrf.mxu1 }
0x1601   :  { %v1502_v15 = vadd.f32 %v2131_v14, %v1501_v12 }
0x1602   :  { %v1969_v13 = vpop.f32.mrf.mxu1 }
0x1604   :  { %v1504_v16 = vpop.f32.mrf.mxu1  ;;  %v1548_v21 = vpop.f32.mrf.mxu0 }
0x1605   :  { %v1554_v22 = vadd.f32 %v1548_v21, %v1502_v15 }
0x1606   :  { %v1970_v23 = vpop.f32.mrf.mxu1  ;;  %v1977_v24 = vpop.f32.mrf.mxu0 }
0x1607   :  { %2123 = vtanh.f32 %v1554_v22  ;;  %v1721_v28 = vmul.f32 -1.442695, %v1554_v22 }
0x1608   :  { %v1551_v25 = vpop.f32.mrf.mxu0 }
0x1609   :  { %2125 = vpow2.f32 %v1721_v28 }
0x160a   :  { %v1978_v5 = vpop.f32.mrf.mxu0 }
0x1614   :  { %v2124_v26 = vpop.eup %2123 }
0x1615   :  { %1564 = vrot.lane.b32.xlu0 %v2124_v26, %s2156_s13 }
0x1616   :  { %v2126_v29 = vpop.eup %2125 }
0x1617   :  { %v1558_v30 = vadd.f32 1.0, %v2126_v29 }
0x1619   :  { %2127 = vrcp.f32 %v1558_v30 }
0x1626   :  { %v2128_v18 = vpop.eup %2127 }
0x1627   :  { %v1562_v33 = vmul.f32 %v2128_v18, %v1452_v59 }
0x1687   :  { %v1565_v31 = vpop.permute.xlu0 %1564 }
0x1688   :  { %v1567_v32 = vmul.f32 %v2128_v18, %v1565_v31 }
0x168a   :  { %1569 = vrot.lane.b32.xlu1 %v1567_v32, %s2158_s21 }
0x16fc   :  { %v1570_v34 = vpop.permute.xlu1 %1569 }
0x16fd   :  { %v1572_v20 = vadd.f32 %v1570_v34, %v1562_v33 }
0x16ff   :  { %2129 = vtanh.f32 %v1572_v20 }
0x170c   :  { %v2130_v36 = vpop.eup %2129 }
0x170d   :  { %1575 = vrot.lane.b32.xlu0 %v2130_v36, %s2156_s13 }
0x177f   :  { %v1576_v38 = vpop.permute.xlu0 %1575 }
0x1780   :  { %v1578_v3 = vmul.f32 %v2128_v18, %v1576_v38 }
0x1782   :  { %v1583_v17 = vrot.slane %v1578_v3, 6 }
0x1784   :  { %v1586_v40 = vsel %vm1585_vm3, %v1580_v39, %v1583_v17 }
0x1785   :  { %v1587_v41 = vpack.c.bf16 %v1586_v40, %v1586_v40 }
0x1787   :  { %1600 = vrot.lane.b32.xlu1 %v1587_v41, %s2158_s21 }
0x17f9   :  { %v1601_v6 = vpop.permute.xlu1 %1600 }
0x17fa   :  { %1984 = vmatmul.mubr.msk.bf16.vlgmr.msra.gmra.mxu1 %vm148_vm2, %v1601_v6 }
0x18ba   :  { %v1651_v19 = vpop.f32.mrf.mxu1 }
0x18bb   :  { %v1652_v42 = vadd.f32 %v1722_v1, %v1651_v19 }
0x18bc   :  { %v1985_v8 = vpop.f32.mrf.mxu1 }
0x18bd   :  { %1658 = vst.msk [vmem:[#allocation2] sm:$0xf] %vm1657_vm4, %v1652_v42 }
0x18be   :  { %v1654_v43 = vpop.f32.mrf.mxu1 }
0x18bf   :  { %2143 = shalt.err (!%p2140_p4)
}
0x18c0   :  { %1668 = dma.vmem_to_hbm [thread:$0]  %s1666_s12, 64, %s2572_s9, [#allocation3]   ;;  %v1986_v45 = vpop.f32.mrf.mxu1 }
0x18c1   :  { %2152 = dma.done.wait [#allocation3], 64  }
0x18c2   :  { %2153 = vsyncadd [#allocation3], 4294967232 }
0x18c3   :  { %1672 = vsyncpa [#allocation3], 1 }

</bundles_post_ra>
